<compile_context>
chip_gen: v6e
topology: v6e:2x2x1
jax: 0.10.0
libtpu: 0.0.40
codegen_flags: <defaults>
</compile_context>

<pallas_src>
import jax
import jax.numpy as jnp
from jax import lax
from jax.experimental import pallas as pl
from jax.experimental.pallas import tpu as pltpu

B = 2            # batch
L = 16           # sequence length (power of 2, multiple of 8: row & (L-1)
                 # gives the within-sequence position on the flattened axis)
C_IN = 2         # Conv1d in_channels after torch.flatten(x, 1, 2)
HID = (128, 256, 128)
KS = (7, 5, 3)
EPS = 1e-5
BL = B * L
K0C = KS[0] * C_IN        # 14
K0C_PAD = 16              # conv1 contraction padded to a multiple of 8

assert L & (L - 1) == 0 and L % 8 == 0 and BL % 8 == 0

# ---- packed parameter slab layout (f32, (32, 256)) --------------------------
SLAB_ROWS, SLAB_LANES = 32, 256
ROW_W1 = 0      # rows 0:16, lanes 0:128  -> im2col conv1 weight (16, 128)
ROW_G1 = 16     # lanes 0:128
ROW_B1 = 17     # lanes 0:128
ROW_G2 = 18     # lanes 0:256
ROW_B2 = 19     # lanes 0:256
ROW_G3 = 20     # lanes 0:128
ROW_B3 = 21     # lanes 0:128
ROW_FC = 22     # lanes 0:128 = fc weight; lanes 128:256 = fc bias (broadcast)
ROW_POOL = 24   # rows 24:32, lanes 0:BL -> (8, BL) GAP pooling matrix (1/L)


def _bn_relu(a, gamma, beta, ones_row):
    """Training-mode BatchNorm1d (biased batch stats over B*L) + ReLU.

    Batch stats are computed on the (idle) MXU with a single
    ones(1,BL) @ [a | a*a] matmul; the affine folds into one scale/shift VPU
    pass; rsqrt stays on the EUP."""
    c = a.shape[-1]
    sums = jnp.dot(ones_row, jnp.concatenate([a, a * a], axis=-1),
                   preferred_element_type=jnp.float32)           # (1, 2C)
    inv_n = 1.0 / BL
    mu = sums[:, :c] * inv_n                                     # (1, C)
    var = sums[:, c:] * inv_n - mu * mu                          # (1, C)
    scale = gamma * lax.rsqrt(var + EPS)
    shift = beta - mu * scale
    return jnp.maximum(a * scale + shift, 0.0)                   # (BL, C)


def _im2col_bf16(h, ksize):
    """(BL, C) f32 -> (BL, ksize*C) bf16 im2col patches of a same-padded,
    stride-1 conv.

    Shifts use pltpu.roll (XLU, circular) over the flattened sublane axis; an
    iota row-mask (one compare per tap) zeroes taps whose source position
    falls outside [0, L), which also prevents cross-batch leakage from the
    circular roll. All rolls/masks stay f32; the concat is cast to bf16 in a
    single fused pass."""
    c = h.shape[-1]
    lpos = lax.broadcasted_iota(jnp.int32, (BL, c), 0) & (L - 1)  # l = row % L
    pad = ksize // 2
    pieces = []
    for k in range(ksize):
        o = k - pad                                     # input offset of tap k
        if o == 0:
            pieces.append(h)
        else:
            shifted = pltpu.roll(h, (-o) % BL, axis=0)  # shifted[r]=h[(r+o)%BL]
            valid = (lpos < L - o) if o > 0 else (lpos >= -o)
            pieces.append(jnp.where(valid, shifted, 0.0))
    return jnp.concatenate(pieces, axis=-1).astype(jnp.bfloat16)


def fcn_kernel(x1_ref, slab_ref, w2_hbm, w3_hbm, out_ref, w2_buf, w3_buf, sem):
    # Kick off the big bf16 conv-weight DMAs so they overlap conv1/BN1/im2col.
    cp2 = pltpu.make_async_copy(w2_hbm, w2_buf, sem.at[0])
    cp3 = pltpu.make_async_copy(w3_hbm, w3_buf, sem.at[1])
    cp2.start()
    cp3.start()

    # Unpack the single packed parameter slab (zero-cost static slices).
    w1 = slab_ref[ROW_W1:ROW_W1 + K0C_PAD, 0:HID[0]]
    g1 = slab_ref[ROW_G1:ROW_G1 + 1, 0:HID[0]]
    b1 = slab_ref[ROW_B1:ROW_B1 + 1, 0:HID[0]]
    g2 = slab_ref[ROW_G2:ROW_G2 + 1, 0:HID[1]]
    b2 = slab_ref[ROW_B2:ROW_B2 + 1, 0:HID[1]]
    g3 = slab_ref[ROW_G3:ROW_G3 + 1, 0:HID[2]]
    b3 = slab_ref[ROW_B3:ROW_B3 + 1, 0:HID[2]]
    wfc = slab_ref[ROW_FC:ROW_FC + 1, 0:HID[2]]
    bfc = slab_ref[ROW_FC:ROW_FC + 1, 128:256]          # bias broadcast row
    pool = slab_ref[ROW_POOL:ROW_POOL + 8, 0:BL]        # (8, BL) GAP matrix

    ones_row = jnp.full((1, BL), 1.0, dtype=jnp.float32)   # hoisted, reused 3x

    # conv block 1: one f32 matmul over the wrapper-built, 16-padded im2col.
    a1 = jnp.dot(x1_ref[...], w1, preferred_element_type=jnp.float32)
    h1 = _bn_relu(a1, g1, b1, ones_row)                  # (BL, 128)

    # conv block 2: taps folded into the contraction dim -> one MXU matmul.
    lhs2 = _im2col_bf16(h1, KS[1])                       # (BL, 640) bf16
    cp2.wait()
    a2 = jnp.dot(lhs2, w2_buf[...], preferred_element_type=jnp.float32)
    h2 = _bn_relu(a2, g2, b2, ones_row)                  # (BL, 256)

    # conv block 3.
    lhs3 = _im2col_bf16(h2, KS[2])                       # (BL, 768) bf16
    cp3.wait()
    a3 = jnp.dot(lhs3, w3_buf[...], preferred_element_type=jnp.float32)
    h3 = _bn_relu(a3, g3, b3, ones_row)                  # (BL, 128)

    # Global average pool as an MXU matmul with the packed (8, BL) pooling
    # matrix (rows >= B are zero), then Linear(128 -> 1) as a VPU multiply +
    # lane reduction, sigmoid, and a lane-dense (8, 128) store.
    pooled = jnp.dot(pool, h3, preferred_element_type=jnp.float32)   # (8, 128)
    logits = jnp.sum(pooled * wfc, axis=-1, keepdims=True) + bfc     # (8, 128)
    out_ref[...] = 1.0 / (1.0 + jnp.exp(-logits))


def init_params(key):
    """Deterministic synthetic parameters with PyTorch-equivalent shapes,
    pre-transformed to the im2col weight layout and packed into the slab."""
    k = jax.random.split(key, 5)
    w1 = jax.random.normal(k[0], (HID[0], C_IN, KS[0]), jnp.float32) * 0.1
    w2 = jax.random.normal(k[1], (HID[1], HID[0], KS[1]), jnp.float32) * 0.05
    w3 = jax.random.normal(k[2], (HID[2], HID[1], KS[2]), jnp.float32) * 0.05
    wfc = jax.random.normal(k[3], (1, HID[2]), jnp.float32) * 0.1
    bfc = jax.random.normal(k[4], (1,), jnp.float32) * 0.1
    g1, b1 = jnp.ones((HID[0],), jnp.float32), jnp.zeros((HID[0],), jnp.float32)
    g2, b2 = jnp.ones((HID[1],), jnp.float32), jnp.zeros((HID[1],), jnp.float32)
    g3, b3 = jnp.ones((HID[2],), jnp.float32), jnp.zeros((HID[2],), jnp.float32)

    def im2col_w(w):
        # torch (Cout, Cin, K) -> (K*Cin, Cout); rows ordered (tap, cin) to
        # match the im2col column ordering on the LHS.
        kk, cin, cout = w.shape[2], w.shape[1], w.shape[0]
        return jnp.transpose(w, (2, 1, 0)).reshape(kk * cin, cout)

    w1k = im2col_w(w1)                                           # (14, 128)
    w1p = jnp.pad(w1k, ((0, K0C_PAD - K0C), (0, 0)))             # (16, 128)
    w2k = im2col_w(w2).astype(jnp.bfloat16)                      # (640, 256)
    w3k = im2col_w(w3).astype(jnp.bfloat16)                      # (768, 128)

    slab = jnp.zeros((SLAB_ROWS, SLAB_LANES), jnp.float32)
    slab = slab.at[ROW_W1:ROW_W1 + K0C_PAD, 0:HID[0]].set(w1p)
    slab = slab.at[ROW_G1, 0:HID[0]].set(g1)
    slab = slab.at[ROW_B1, 0:HID[0]].set(b1)
    slab = slab.at[ROW_G2, 0:HID[1]].set(g2)
    slab = slab.at[ROW_B2, 0:HID[1]].set(b2)
    slab = slab.at[ROW_G3, 0:HID[2]].set(g3)
    slab = slab.at[ROW_B3, 0:HID[2]].set(b3)
    slab = slab.at[ROW_FC, 0:HID[2]].set(wfc.reshape(-1))
    slab = slab.at[ROW_FC, 128:256].set(jnp.full((128,), bfc[0], jnp.float32))
    pool = jnp.zeros((8, BL), jnp.float32)
    for bi in range(B):
        pool = pool.at[bi, bi * L:(bi + 1) * L].set(1.0 / L)
    slab = slab.at[ROW_POOL:ROW_POOL + 8, 0:BL].set(pool)

    raw = dict(w1=w1k, w2=w2k, w3=w3k, wfc=wfc, bfc=bfc,
               g1=g1, b1=b1, g2=g2, b2=b2, g3=g3, b3=b3)
    return raw, (slab, w2k, w3k)


def fcn_forward(x, kernel_params):
    slab, w2k, w3k = kernel_params
    # torch.flatten(x, 1, 2).float() -> (B, C_IN, L), channels-last, then
    # im2col of the tiny raw input (zero 'same' padding) so the kernel's first
    # conv is a single (BL, 16) @ (16, 128) matmul (contraction padded 14->16).
    xb = x.reshape(x.shape[0], -1, x.shape[-1]).astype(jnp.float32)
    x_nlc = jnp.transpose(xb, (0, 2, 1))                          # (B, L, C_IN)
    p1 = KS[0] // 2
    xpad = jnp.pad(x_nlc, ((0, 0), (p1, p1), (0, 0)))
    cols = jnp.concatenate([xpad[:, k:k + L, :] for k in range(KS[0])], axis=-1)
    x1 = cols.reshape(BL, K0C)
    x1 = jnp.pad(x1, ((0, 0), (0, K0C_PAD - K0C)))                # (BL, 16)

    vmem = pl.BlockSpec(memory_space=pltpu.MemorySpace.VMEM)
    anyspace = pl.BlockSpec(memory_space=pl.ANY)

    flops = (2 * BL * (K0C_PAD * HID[0] + KS[1] * HID[0] * HID[1]
                       + KS[2] * HID[1] * HID[2])
             + 2 * BL * 2 * sum(HID)          # BN sum / sum-of-squares matmuls
             + 2 * 8 * BL * HID[2] + 2 * 8 * HID[2])   # GAP matmul + head
    bytes_accessed = int(x1.size * 4 + slab.size * 4
                         + w2k.size * 2 + w3k.size * 2 + 8 * 128 * 4)

    out = pl.pallas_call(
        fcn_kernel,
        out_shape=jax.ShapeDtypeStruct((8, 128), jnp.float32),
        in_specs=[vmem, vmem, anyspace, anyspace],
        out_specs=vmem,
        scratch_shapes=[
            pltpu.VMEM((KS[1] * HID[0], HID[1]), jnp.bfloat16),   # w2 buffer
            pltpu.VMEM((KS[2] * HID[1], HID[2]), jnp.bfloat16),   # w3 buffer
            pltpu.SemaphoreType.DMA((2,)),
        ],
        cost_estimate=pl.CostEstimate(flops=flops,
                                      transcendentals=sum(HID) + 8 * 128,
                                      bytes_accessed=bytes_accessed),
    )(x1, slab, w2k, w3k)
    return out[:B, 0]                                  # torch.flatten -> (B,)


def fcn_reference(x, raw):
    """Pure-JAX reference (no Pallas): same conv dtypes as the kernel, but
    windows built by pad + static slicing and two-pass BN variance —
    independently validates roll direction, masking and the one-pass stats."""
    xb = x.reshape(x.shape[0], -1, x.shape[-1]).astype(jnp.float32)
    h = jnp.transpose(xb, (0, 2, 1))                              # (B, L, C)

    def conv_bn_relu(h, w2d, gamma, beta, ksize, lhs_dtype):
        pad = ksize // 2
        hp = jnp.pad(h, ((0, 0), (pad, pad), (0, 0)))
        cols = jnp.concatenate([hp[:, k:k + L, :] for k in range(ksize)], axis=-1)
        lhs = cols.reshape(BL, ksize * h.shape[-1]).astype(lhs_dtype)
        a = jnp.dot(lhs, w2d.astype(lhs_dtype), preferred_element_type=jnp.float32)
        mu = jnp.mean(a, axis=0, keepdims=True)
        var = jnp.mean((a - mu) ** 2, axis=0, keepdims=True)      # two-pass gold
        scale = gamma * lax.rsqrt(var + EPS)
        y = jnp.maximum(a * scale + (beta - mu * scale), 0.0)
        return y.reshape(B, L, -1)

    h = conv_bn_relu(h, raw['w1'], raw['g1'], raw['b1'], KS[0], jnp.float32)
    h = conv_bn_relu(h, raw['w2'], raw['g2'], raw['b2'], KS[1], jnp.bfloat16)
    h = conv_bn_relu(h, raw['w3'], raw['g3'], raw['b3'], KS[2], jnp.bfloat16)
    pooled = jnp.mean(h, axis=1)                                  # (B, HID2)
    logits = jnp.sum(pooled * raw['wfc'], axis=-1, keepdims=True) + raw['bfc']
    return (1.0 / (1.0 + jnp.exp(-logits))).reshape(-1)


if __name__ == "__main__":
    key = jax.random.PRNGKey(0)
    kx, kp = jax.random.split(key)
    # 4-D input so torch.flatten(x, 1, 2) yields C_IN=2 channels: (B, 2, 1, L)
    x = jax.random.normal(kx, (B, C_IN, 1, L), jnp.float32)
    raw, kernel_params = init_params(kp)

    out = fcn_forward(x, kernel_params)
    jax.block_until_ready(out)
    assert out.shape == (B,)
    assert bool(jnp.all(jnp.isfinite(out))) and bool(jnp.all((out > 0) & (out < 1)))

    ref = fcn_reference(x, raw)
    max_err = float(jnp.max(jnp.abs(out - ref)))
    assert max_err < 5e-3, f"kernel/reference mismatch: {max_err}"
    print("KERNEL_OK")
</pallas_src>

<mosaic_0001>
module attributes {stable_mosaic.version = 11 : i64} {
  func.func @fcn_kernel(%arg0: memref<32x16xf32, #tpu.memory_space<vmem>>, %arg1: memref<32x256xf32, #tpu.memory_space<vmem>>, %arg2: memref<640x256xbf16, #tpu.memory_space<any>>, %arg3: memref<768x128xbf16, #tpu.memory_space<any>>, %arg4: memref<8x128xf32, #tpu.memory_space<vmem>>, %arg5: memref<640x256xbf16, #tpu.memory_space<vmem>>, %arg6: memref<768x128xbf16, #tpu.memory_space<vmem>>, %arg7: memref<2x!tpu.dma_semaphore, #tpu.memory_space<semaphore_mem>>) attributes {dimension_semantics = [], scalar_prefetch = 0 : i64, scratch_operands = 3 : i64, tpu.core_type = #tpu.core_type<tc>} {
    %c0_i32 = arith.constant 0 : i32
    %0 = tpu.memref_slice %arg7[%c0_i32] : memref<2x!tpu.dma_semaphore, #tpu.memory_space<semaphore_mem>> -> memref<1x!tpu.dma_semaphore, #tpu.memory_space<semaphore_mem>>
    %1 = tpu.memref_squeeze %0 : memref<1x!tpu.dma_semaphore, #tpu.memory_space<semaphore_mem>> -> memref<!tpu.dma_semaphore, #tpu.memory_space<semaphore_mem>>
    tpu.enqueue_dma source(%arg2 : memref<640x256xbf16, #tpu.memory_space<any>>) target(%arg5 : memref<640x256xbf16, #tpu.memory_space<vmem>>) target_semaphore(%1 : memref<!tpu.dma_semaphore, #tpu.memory_space<semaphore_mem>>)
    %c1_i32 = arith.constant 1 : i32
    %2 = tpu.memref_slice %arg7[%c1_i32] : memref<2x!tpu.dma_semaphore, #tpu.memory_space<semaphore_mem>> -> memref<1x!tpu.dma_semaphore, #tpu.memory_space<semaphore_mem>>
    %3 = tpu.memref_squeeze %2 : memref<1x!tpu.dma_semaphore, #tpu.memory_space<semaphore_mem>> -> memref<!tpu.dma_semaphore, #tpu.memory_space<semaphore_mem>>
    tpu.enqueue_dma source(%arg3 : memref<768x128xbf16, #tpu.memory_space<any>>) target(%arg6 : memref<768x128xbf16, #tpu.memory_space<vmem>>) target_semaphore(%3 : memref<!tpu.dma_semaphore, #tpu.memory_space<semaphore_mem>>)
    %c0 = arith.constant 0 : index
    %c0_0 = arith.constant 0 : index
    %4 = vector.load %arg1[%c0, %c0_0] : memref<32x256xf32, #tpu.memory_space<vmem>>, vector<16x128xf32>
    %c16 = arith.constant 16 : index
    %c0_1 = arith.constant 0 : index
    %5 = vector.load %arg1[%c16, %c0_1] : memref<32x256xf32, #tpu.memory_space<vmem>>, vector<1x128xf32>
    %c17 = arith.constant 17 : index
    %c0_2 = arith.constant 0 : index
    %6 = vector.load %arg1[%c17, %c0_2] : memref<32x256xf32, #tpu.memory_space<vmem>>, vector<1x128xf32>
    %c18 = arith.constant 18 : index
    %c0_3 = arith.constant 0 : index
    %7 = vector.load %arg1[%c18, %c0_3] : memref<32x256xf32, #tpu.memory_space<vmem>>, vector<1x256xf32>
    %c19 = arith.constant 19 : index
    %c0_4 = arith.constant 0 : index
    %8 = vector.load %arg1[%c19, %c0_4] : memref<32x256xf32, #tpu.memory_space<vmem>>, vector<1x256xf32>
    %c20 = arith.constant 20 : index
    %c0_5 = arith.constant 0 : index
    %9 = vector.load %arg1[%c20, %c0_5] : memref<32x256xf32, #tpu.memory_space<vmem>>, vector<1x128xf32>
    %c21 = arith.constant 21 : index
    %c0_6 = arith.constant 0 : index
    %10 = vector.load %arg1[%c21, %c0_6] : memref<32x256xf32, #tpu.memory_space<vmem>>, vector<1x128xf32>
    %c22 = arith.constant 22 : index
    %c0_7 = arith.constant 0 : index
    %11 = vector.load %arg1[%c22, %c0_7] : memref<32x256xf32, #tpu.memory_space<vmem>>, vector<1x128xf32>
    %c22_8 = arith.constant 22 : index
    %c128 = arith.constant 128 : index
    %12 = vector.load %arg1[%c22_8, %c128] : memref<32x256xf32, #tpu.memory_space<vmem>>, vector<1x128xf32>
    %c24 = arith.constant 24 : index
    %c0_9 = arith.constant 0 : index
    %13 = vector.load %arg1[%c24, %c0_9] : memref<32x256xf32, #tpu.memory_space<vmem>>, vector<8x32xf32>
    %cst = arith.constant 1.000000e+00 : f32
    %14 = vector.broadcast %cst : f32 to vector<1x32xf32>
    %c0_10 = arith.constant 0 : index
    %c0_11 = arith.constant 0 : index
    %15 = vector.load %arg0[%c0_10, %c0_11] : memref<32x16xf32, #tpu.memory_space<vmem>>, vector<32x16xf32>
    %cst_12 = arith.constant dense<0.000000e+00> : vector<32x128xf32>
    %16 = tpu.matmul %15, %4, %cst_12 {dimension_numbers = #tpu.dot_dimension_numbers<[1], [0], [0], [1], [0, 0, 1, 1], [], []>} : vector<32x16xf32>, vector<16x128xf32>, vector<32x128xf32> -> vector<32x128xf32>
    %17 = arith.mulf %16, %16 : vector<32x128xf32>
    %18 = tpu.concatenate %16, %17 in 1 : vector<32x128xf32>, vector<32x128xf32> -> vector<32x256xf32>
    %cst_13 = arith.constant dense<0.000000e+00> : vector<1x256xf32>
    %19 = tpu.matmul %14, %18, %cst_13 {dimension_numbers = #tpu.dot_dimension_numbers<[1], [0], [0], [1], [0, 0, 1, 1], [], []>} : vector<1x32xf32>, vector<32x256xf32>, vector<1x256xf32> -> vector<1x256xf32>
    %20 = vector.extract_strided_slice %19 {offsets = [0, 0], sizes = [1, 128], strides = [1, 1]} : vector<1x256xf32> to vector<1x128xf32>
    %cst_14 = arith.constant 3.125000e-02 : f32
    %21 = vector.broadcast %cst_14 : f32 to vector<1x128xf32>
    %22 = arith.mulf %20, %21 : vector<1x128xf32>
    %23 = vector.extract_strided_slice %19 {offsets = [0, 128], sizes = [1, 128], strides = [1, 1]} : vector<1x256xf32> to vector<1x128xf32>
    %cst_15 = arith.constant 3.125000e-02 : f32
    %24 = vector.broadcast %cst_15 : f32 to vector<1x128xf32>
    %25 = arith.mulf %23, %24 : vector<1x128xf32>
    %26 = arith.mulf %22, %22 : vector<1x128xf32>
    %27 = arith.subf %25, %26 : vector<1x128xf32>
    %cst_16 = arith.constant 9.99999974E-6 : f32
    %28 = vector.broadcast %cst_16 : f32 to vector<1x128xf32>
    %29 = arith.addf %27, %28 : vector<1x128xf32>
    %30 = math.rsqrt %29 : vector<1x128xf32>
    %31 = arith.mulf %5, %30 : vector<1x128xf32>
    %32 = arith.mulf %22, %31 : vector<1x128xf32>
    %33 = arith.subf %6, %32 : vector<1x128xf32>
    %34 = vector.broadcast %31 : vector<1x128xf32> to vector<32x128xf32>
    %35 = arith.mulf %16, %34 : vector<32x128xf32>
    %36 = vector.broadcast %33 : vector<1x128xf32> to vector<32x128xf32>
    %37 = arith.addf %35, %36 : vector<32x128xf32>
    %cst_17 = arith.constant 0.000000e+00 : f32
    %38 = vector.broadcast %cst_17 : f32 to vector<32x128xf32>
    %39 = arith.maximumf %37, %38 : vector<32x128xf32>
    %40 = tpu.iota {dimensions = array<i32: 0>} : vector<32x128xi32>
    %c15_i32 = arith.constant 15 : i32
    %41 = vector.broadcast %c15_i32 : i32 to vector<32x128xi32>
    %42 = arith.andi %40, %41 : vector<32x128xi32>
    %c2_i32 = arith.constant 2 : i32
    %43 = tpu.dynamic_rotate %39 by %c2_i32 dim 0 : vector<32x128xf32>, i32 -> vector<32x128xf32>
    %c2_i32_18 = arith.constant 2 : i32
    %44 = vector.broadcast %c2_i32_18 : i32 to vector<32x128xi32>
    %45 = arith.cmpi sge, %42, %44 : vector<32x128xi32>
    %cst_19 = arith.constant 0.000000e+00 : f32
    %46 = vector.broadcast %cst_19 : f32 to vector<32x128xf32>
    %47 = arith.select %45, %43, %46 : vector<32x128xi1>, vector<32x128xf32>
    %c1_i32_20 = arith.constant 1 : i32
    %48 = tpu.dynamic_rotate %39 by %c1_i32_20 dim 0 : vector<32x128xf32>, i32 -> vector<32x128xf32>
    %c1_i32_21 = arith.constant 1 : i32
    %49 = vector.broadcast %c1_i32_21 : i32 to vector<32x128xi32>
    %50 = arith.cmpi sge, %42, %49 : vector<32x128xi32>
    %cst_22 = arith.constant 0.000000e+00 : f32
    %51 = vector.broadcast %cst_22 : f32 to vector<32x128xf32>
    %52 = arith.select %50, %48, %51 : vector<32x128xi1>, vector<32x128xf32>
    %c31_i32 = arith.constant 31 : i32
    %53 = tpu.dynamic_rotate %39 by %c31_i32 dim 0 : vector<32x128xf32>, i32 -> vector<32x128xf32>
    %c15_i32_23 = arith.constant 15 : i32
    %54 = vector.broadcast %c15_i32_23 : i32 to vector<32x128xi32>
    %55 = arith.cmpi slt, %42, %54 : vector<32x128xi32>
    %cst_24 = arith.constant 0.000000e+00 : f32
    %56 = vector.broadcast %cst_24 : f32 to vector<32x128xf32>
    %57 = arith.select %55, %53, %56 : vector<32x128xi1>, vector<32x128xf32>
    %c30_i32 = arith.constant 30 : i32
    %58 = tpu.dynamic_rotate %39 by %c30_i32 dim 0 : vector<32x128xf32>, i32 -> vector<32x128xf32>
    %c14_i32 = arith.constant 14 : i32
    %59 = vector.broadcast %c14_i32 : i32 to vector<32x128xi32>
    %60 = arith.cmpi slt, %42, %59 : vector<32x128xi32>
    %cst_25 = arith.constant 0.000000e+00 : f32
    %61 = vector.broadcast %cst_25 : f32 to vector<32x128xf32>
    %62 = arith.select %60, %58, %61 : vector<32x128xi1>, vector<32x128xf32>
    %63 = tpu.concatenate %47, %52, %39, %57, %62 in 1 : vector<32x128xf32>, vector<32x128xf32>, vector<32x128xf32>, vector<32x128xf32>, vector<32x128xf32> -> vector<32x640xf32>
    %64 = arith.truncf %63 : vector<32x640xf32> to vector<32x640xbf16>
    %c0_i32_26 = arith.constant 0 : i32
    %65 = tpu.memref_slice %arg7[%c0_i32_26] : memref<2x!tpu.dma_semaphore, #tpu.memory_space<semaphore_mem>> -> memref<1x!tpu.dma_semaphore, #tpu.memory_space<semaphore_mem>>
    %66 = tpu.memref_squeeze %65 : memref<1x!tpu.dma_semaphore, #tpu.memory_space<semaphore_mem>> -> memref<!tpu.dma_semaphore, #tpu.memory_space<semaphore_mem>>
    tpu.wait_dma2 semaphore(%66 : memref<!tpu.dma_semaphore, #tpu.memory_space<semaphore_mem>>) src(%arg2 : memref<640x256xbf16, #tpu.memory_space<any>>) dst(%arg5 : memref<640x256xbf16, #tpu.memory_space<vmem>>)
    %c0_27 = arith.constant 0 : index
    %c0_28 = arith.constant 0 : index
    %67 = vector.load %arg5[%c0_27, %c0_28] : memref<640x256xbf16, #tpu.memory_space<vmem>>, vector<640x256xbf16>
    %cst_29 = arith.constant dense<0.000000e+00> : vector<32x256xf32>
    %68 = tpu.matmul %64, %67, %cst_29 {dimension_numbers = #tpu.dot_dimension_numbers<[1], [0], [0], [1], [0, 0, 1, 1], [], []>} : vector<32x640xbf16>, vector<640x256xbf16>, vector<32x256xf32> -> vector<32x256xf32>
    %69 = arith.mulf %68, %68 : vector<32x256xf32>
    %70 = tpu.concatenate %68, %69 in 1 : vector<32x256xf32>, vector<32x256xf32> -> vector<32x512xf32>
    %cst_30 = arith.constant dense<0.000000e+00> : vector<1x512xf32>
    %71 = tpu.matmul %14, %70, %cst_30 {dimension_numbers = #tpu.dot_dimension_numbers<[1], [0], [0], [1], [0, 0, 1, 1], [], []>} : vector<1x32xf32>, vector<32x512xf32>, vector<1x512xf32> -> vector<1x512xf32>
    %72 = vector.extract_strided_slice %71 {offsets = [0, 0], sizes = [1, 256], strides = [1, 1]} : vector<1x512xf32> to vector<1x256xf32>
    %cst_31 = arith.constant 3.125000e-02 : f32
    %73 = vector.broadcast %cst_31 : f32 to vector<1x256xf32>
    %74 = arith.mulf %72, %73 : vector<1x256xf32>
    %75 = vector.extract_strided_slice %71 {offsets = [0, 256], sizes = [1, 256], strides = [1, 1]} : vector<1x512xf32> to vector<1x256xf32>
    %cst_32 = arith.constant 3.125000e-02 : f32
    %76 = vector.broadcast %cst_32 : f32 to vector<1x256xf32>
    %77 = arith.mulf %75, %76 : vector<1x256xf32>
    %78 = arith.mulf %74, %74 : vector<1x256xf32>
    %79 = arith.subf %77, %78 : vector<1x256xf32>
    %cst_33 = arith.constant 9.99999974E-6 : f32
    %80 = vector.broadcast %cst_33 : f32 to vector<1x256xf32>
    %81 = arith.addf %79, %80 : vector<1x256xf32>
    %82 = math.rsqrt %81 : vector<1x256xf32>
    %83 = arith.mulf %7, %82 : vector<1x256xf32>
    %84 = arith.mulf %74, %83 : vector<1x256xf32>
    %85 = arith.subf %8, %84 : vector<1x256xf32>
    %86 = vector.broadcast %83 : vector<1x256xf32> to vector<32x256xf32>
    %87 = arith.mulf %68, %86 : vector<32x256xf32>
    %88 = vector.broadcast %85 : vector<1x256xf32> to vector<32x256xf32>
    %89 = arith.addf %87, %88 : vector<32x256xf32>
    %cst_34 = arith.constant 0.000000e+00 : f32
    %90 = vector.broadcast %cst_34 : f32 to vector<32x256xf32>
    %91 = arith.maximumf %89, %90 : vector<32x256xf32>
    %92 = tpu.iota {dimensions = array<i32: 0>} : vector<32x256xi32>
    %c15_i32_35 = arith.constant 15 : i32
    %93 = vector.broadcast %c15_i32_35 : i32 to vector<32x256xi32>
    %94 = arith.andi %92, %93 : vector<32x256xi32>
    %c1_i32_36 = arith.constant 1 : i32
    %95 = tpu.dynamic_rotate %91 by %c1_i32_36 dim 0 : vector<32x256xf32>, i32 -> vector<32x256xf32>
    %c1_i32_37 = arith.constant 1 : i32
    %96 = vector.broadcast %c1_i32_37 : i32 to vector<32x256xi32>
    %97 = arith.cmpi sge, %94, %96 : vector<32x256xi32>
    %cst_38 = arith.constant 0.000000e+00 : f32
    %98 = vector.broadcast %cst_38 : f32 to vector<32x256xf32>
    %99 = arith.select %97, %95, %98 : vector<32x256xi1>, vector<32x256xf32>
    %c31_i32_39 = arith.constant 31 : i32
    %100 = tpu.dynamic_rotate %91 by %c31_i32_39 dim 0 : vector<32x256xf32>, i32 -> vector<32x256xf32>
    %c15_i32_40 = arith.constant 15 : i32
    %101 = vector.broadcast %c15_i32_40 : i32 to vector<32x256xi32>
    %102 = arith.cmpi slt, %94, %101 : vector<32x256xi32>
    %cst_41 = arith.constant 0.000000e+00 : f32
    %103 = vector.broadcast %cst_41 : f32 to vector<32x256xf32>
    %104 = arith.select %102, %100, %103 : vector<32x256xi1>, vector<32x256xf32>
    %105 = tpu.concatenate %99, %91, %104 in 1 : vector<32x256xf32>, vector<32x256xf32>, vector<32x256xf32> -> vector<32x768xf32>
    %106 = arith.truncf %105 : vector<32x768xf32> to vector<32x768xbf16>
    %c1_i32_42 = arith.constant 1 : i32
    %107 = tpu.memref_slice %arg7[%c1_i32_42] : memref<2x!tpu.dma_semaphore, #tpu.memory_space<semaphore_mem>> -> memref<1x!tpu.dma_semaphore, #tpu.memory_space<semaphore_mem>>
    %108 = tpu.memref_squeeze %107 : memref<1x!tpu.dma_semaphore, #tpu.memory_space<semaphore_mem>> -> memref<!tpu.dma_semaphore, #tpu.memory_space<semaphore_mem>>
    tpu.wait_dma2 semaphore(%108 : memref<!tpu.dma_semaphore, #tpu.memory_space<semaphore_mem>>) src(%arg3 : memref<768x128xbf16, #tpu.memory_space<any>>) dst(%arg6 : memref<768x128xbf16, #tpu.memory_space<vmem>>)
    %c0_43 = arith.constant 0 : index
    %c0_44 = arith.constant 0 : index
    %109 = vector.load %arg6[%c0_43, %c0_44] : memref<768x128xbf16, #tpu.memory_space<vmem>>, vector<768x128xbf16>
    %cst_45 = arith.constant dense<0.000000e+00> : vector<32x128xf32>
    %110 = tpu.matmul %106, %109, %cst_45 {dimension_numbers = #tpu.dot_dimension_numbers<[1], [0], [0], [1], [0, 0, 1, 1], [], []>} : vector<32x768xbf16>, vector<768x128xbf16>, vector<32x128xf32> -> vector<32x128xf32>
    %111 = arith.mulf %110, %110 : vector<32x128xf32>
    %112 = tpu.concatenate %110, %111 in 1 : vector<32x128xf32>, vector<32x128xf32> -> vector<32x256xf32>
    %cst_46 = arith.constant dense<0.000000e+00> : vector<1x256xf32>
    %113 = tpu.matmul %14, %112, %cst_46 {dimension_numbers = #tpu.dot_dimension_numbers<[1], [0], [0], [1], [0, 0, 1, 1], [], []>} : vector<1x32xf32>, vector<32x256xf32>, vector<1x256xf32> -> vector<1x256xf32>
    %114 = vector.extract_strided_slice %113 {offsets = [0, 0], sizes = [1, 128], strides = [1, 1]} : vector<1x256xf32> to vector<1x128xf32>
    %cst_47 = arith.constant 3.125000e-02 : f32
    %115 = vector.broadcast %cst_47 : f32 to vector<1x128xf32>
    %116 = arith.mulf %114, %115 : vector<1x128xf32>
    %117 = vector.extract_strided_slice %113 {offsets = [0, 128], sizes = [1, 128], strides = [1, 1]} : vector<1x256xf32> to vector<1x128xf32>
    %cst_48 = arith.constant 3.125000e-02 : f32
    %118 = vector.broadcast %cst_48 : f32 to vector<1x128xf32>
    %119 = arith.mulf %117, %118 : vector<1x128xf32>
    %120 = arith.mulf %116, %116 : vector<1x128xf32>
    %121 = arith.subf %119, %120 : vector<1x128xf32>
    %cst_49 = arith.constant 9.99999974E-6 : f32
    %122 = vector.broadcast %cst_49 : f32 to vector<1x128xf32>
    %123 = arith.addf %121, %122 : vector<1x128xf32>
    %124 = math.rsqrt %123 : vector<1x128xf32>
    %125 = arith.mulf %9, %124 : vector<1x128xf32>
    %126 = arith.mulf %116, %125 : vector<1x128xf32>
    %127 = arith.subf %10, %126 : vector<1x128xf32>
    %128 = vector.broadcast %125 : vector<1x128xf32> to vector<32x128xf32>
    %129 = arith.mulf %110, %128 : vector<32x128xf32>
    %130 = vector.broadcast %127 : vector<1x128xf32> to vector<32x128xf32>
    %131 = arith.addf %129, %130 : vector<32x128xf32>
    %cst_50 = arith.constant 0.000000e+00 : f32
    %132 = vector.broadcast %cst_50 : f32 to vector<32x128xf32>
    %133 = arith.maximumf %131, %132 : vector<32x128xf32>
    %cst_51 = arith.constant dense<0.000000e+00> : vector<8x128xf32>
    %134 = tpu.matmul %13, %133, %cst_51 {dimension_numbers = #tpu.dot_dimension_numbers<[1], [0], [0], [1], [0, 0, 1, 1], [], []>} : vector<8x32xf32>, vector<32x128xf32>, vector<8x128xf32> -> vector<8x128xf32>
    %135 = vector.broadcast %11 : vector<1x128xf32> to vector<8x128xf32>
    %136 = arith.mulf %134, %135 : vector<8x128xf32>
    %cst_52 = arith.constant dense<0.000000e+00> : vector<8xf32>
    %137 = vector.multi_reduction <add>, %136, %cst_52 [1] : vector<8x128xf32> to vector<8xf32>
    %138 = vector.shape_cast %137 : vector<8xf32> to vector<8x1xf32>
    %139 = vector.broadcast %138 : vector<8x1xf32> to vector<8x128xf32>
    %140 = vector.broadcast %12 : vector<1x128xf32> to vector<8x128xf32>
    %141 = arith.addf %139, %140 : vector<8x128xf32>
    %cst_53 = arith.constant 0.000000e+00 : f32
    %142 = vector.broadcast %cst_53 : f32 to vector<8x128xf32>
    %143 = arith.subf %142, %141 : vector<8x128xf32>
    %144 = math.exp %143 : vector<8x128xf32>
    %cst_54 = arith.constant 1.000000e+00 : f32
    %145 = vector.broadcast %cst_54 : f32 to vector<8x128xf32>
    %146 = arith.addf %145, %144 : vector<8x128xf32>
    %cst_55 = arith.constant 1.000000e+00 : f32
    %147 = vector.broadcast %cst_55 : f32 to vector<8x128xf32>
    %148 = arith.divf %147, %146 : vector<8x128xf32>
    %c0_56 = arith.constant 0 : index
    %c0_57 = arith.constant 0 : index
    %149 = vector.load %arg4[%c0_56, %c0_57] : memref<8x128xf32, #tpu.memory_space<vmem>>, vector<8x128xf32>
    tpu.vector_store %arg4[%c0_56, %c0_57], %148 {strides = array<i32>} : memref<8x128xf32, #tpu.memory_space<vmem>>, vector<8x128xf32>,
    return
  }
}

</mosaic_0001>

<bundles_post_ra>
// kernel: tpu_custom_call.1
= control target key start
LH: loop header
LB: loop body
LE: loop exit
PB: predicated region body
PF: predicated region fallthrough
CT: control target
= control target key end

     0   :  { %9 = vsyncpa [#allocation6], 0  ;;  %s3135_s0 = inlined_call_operand.vmem [shape: f32[32,16], index: 0, kind: input, shape index: {}]   ;;  %s3136_s1 = inlined_call_operand.hbm [shape: f32[32,256], index: 1, kind: input, shape index: {}]   ;;  %s3137_s2 = inlined_call_operand.hbm [shape: bf16[640,256], index: 2, kind: input, shape index: {}]   ;;  %s3138_s3 = inlined_call_operand.hbm [shape: bf16[768,128], index: 3, kind: input, shape index: {}]   ;;  %s3139_s4 = inlined_call_operand.hbm [shape: f32[8,128], index: 4, kind: output, shape index: {}]  }
   0x1   :  { %10 = vsyncpa [#allocation7], 0  ;;  %s2647_s15 = smov [#allocation5]  }
   0x2   :  { %s18_s16 = sshll.u32 %s2647_s15, 4  ;;  %s19_s16 = int_to_ptr.vmem [resolvable:$true] %s18_s16 }
   0x3   :  { %s2567_s17 = scalar_lea.vmem %s19_s16, 1024  ;;  %p2572_p1 = scmp.lt.s32.totalorder %s19_s16, %s19_s16 }
   0x4   :  { %p2568_p0 = scmp.ne.s32.totalorder %s19_s16, %s2567_s17  ;;  %p2573_p2 = scmp.lt.s32.totalorder %s2567_s17, %s2567_s17 }
   0x6   :  { %p2574_p3 = por %p2573_p2, %p2572_p1 }
   0x8   :  { %p2575_p4 = pnand %p2574_p3, %p2568_p0 }
   0xa   :  { %2578 = shalt.err (!%p2575_p4)
}
   0xb   :  { %s2648_s18 = smov 256   ;;  %s2649_s19 = smov 16  }
   0xc   :  { %24 = dma.hbm_to_vmem [thread:$0]  %s3136_s1, 1024, %s19_s16, [#allocation6], %s2648_s18, %s2648_s18, %s2649_s19  }
   0xd   :  { %2639 = dma.done.wait [#allocation6], 1024  }
   0xe   :  { %2640 = vsyncadd [#allocation6], 4294966272  ;;  %vm69_vm0 = vcmask 130048   ;;  %v2687_v0 = vld [vmem:[#allocation5 + $0x22] ss:$8 sm:$0x3]  ;;  %v255_v23 = vlaneseq }
   0xf   :  { %v2689_v1 = vld [vmem:[#allocation5 + $0x23] ss:$8 sm:$0x3]  ;;  %v2691_v2 = vld [vmem:[#allocation5 + $0x24] ss:$0 sm:$0xff]  ;;  %v2699_v6 = vld [vmem:[#allocation5 + $0x30] sm:$0xff] }
  0x10   :  { %v2693_v3 = vld [vmem:[#allocation5 + $0x25] ss:$0 sm:$0xff]  ;;  %v2695_v4 = vld [vmem:[#allocation5 + $0x26] ss:$0 sm:$0xff]  ;;  %v2697_v5 = vld [vmem:[#allocation5 + $0x2e] ss:$0 sm:$0xff] }
  0x11   :  { %v53_v7 = vld [vmem:[#allocation5 + $0x10] sm:$0xff]  ;;  %v52_v8 = vld [vmem:[#allocation5] sm:$0xff]  ;;  %v66_v10 = vld [vmem:[%s3135_s0 + $0x8] sm:$0xff]  ;;  %v2650_v13 = vmov 0.0   ;;  %vm171_vm1 = vcmask 261120   ;;  %v2651_v22 = vmov 1.0  }
  0x12   :  { %2346 = vmatprep.subr.mxu0 %v53_v7  ;;  %v65_v9 = vld [vmem:[%s3135_s0] sm:$0xff]  ;;  %v67_v11 = vld [vmem:[%s3135_s0 + $0x10] sm:$0xff]  ;;  %v68_v12 = vld [vmem:[%s3135_s0 + $0x18] sm:$0xff]  ;;  %v2740_v24 = vshrl.u32 %v255_v23, 7  ;;  %s2652_s0 = smov [#allocation2]   ;;  %s2653_s30 = smov [#allocation3]  }
  0x13   :  { %2347 = vmatpush3.msra.mxu0 %v53_v7  ;;  %2350 = vmatprep.mubr.msk.f32.mxu0 %vm69_vm0, %v65_v9  ;;  %s36_s29 = sshll.u32 %s2652_s0, 4  ;;  %s48_s5 = sshll.u32 %s2653_s30, 4  ;;  %s37_s29 = int_to_ptr.vmem [resolvable:$true] %s36_s29  ;;  %s49_s5 = int_to_ptr.vmem [resolvable:$true] %s48_s5 }
  0x14   :  { %2348 = vmatprep.subr.mxu0 %v52_v8  ;;  %v277_v25 = vadd.s32 8, %v2740_v24  ;;  %v278_v26 = vadd.s32 16, %v2740_v24  ;;  %v279_v27 = vadd.s32 24, %v2740_v24  ;;  %v280_v28 = vand.u32 15, %v2740_v24  ;;  %s2587_s6 = scalar_lea.vmem %s37_s29, 10240  ;;  %p2592_p6 = scmp.lt.s32.totalorder %s37_s29, %s37_s29 }
  0x15   :  { %2349 = vmatpush3.msra.mxu0 %v52_v8  ;;  %p2588_p5 = scmp.ne.s32.totalorder %s37_s29, %s2587_s6  ;;  %p2593_p7 = scmp.lt.s32.totalorder %s2587_s6, %s2587_s6 }
  0x16   :  { %2351 = vmatmul.mubr.msk.f32.vlgmr.msra.gmra.mxu0 %vm69_vm0, %v66_v10  ;;  %v282_v29 = vand.u32 15, %v278_v26  ;;  %v281_v30 = vand.u32 15, %v277_v25  ;;  %v283_v31 = vand.u32 15, %v279_v27  ;;  %vm2746_vm2 = vcmp.ge.s32.totalorder %v280_v28, 2 }
  0x17   :  { %2353 = vmatprep.mubr.msk.f32.mxu0 %vm69_vm0, %v67_v11  ;;  %vm2754_vm4 = vcmp.ge.s32.totalorder %v280_v28, 1  ;;  %p2594_p8 = por %p2593_p7, %p2592_p6 }
  0x18   :  { %vm2750_vm3 = vcmp.ge.s32.totalorder %v282_v29, 2  ;;  %vm2758_vm5 = vcmp.ge.s32.totalorder %v282_v29, 1  ;;  %vm2762_vm6 = vcmp.lt.s32.totalorder %v281_v30, 15  ;;  %vm2766_vm7 = vcmp.lt.s32.totalorder %v283_v31, 15 }
  0x19   :  { %vm2770_vm8 = vcmp.lt.s32.totalorder %v281_v30, 14  ;;  %vm2774_vm9 = vcmp.lt.s32.totalorder %v283_v31, 14  ;;  %p2595_p9 = pnand %p2594_p8, %p2588_p5 }
  0x1a   :  { %2354 = vmatmul.mubr.msk.f32.gmra.mxu0 %vm69_vm0, %v68_v12 }
  0x1b   :  { %239 = vmatprep.mubr.f32.mxu0 %v2650_v13 }
  0xd6   :  { %v2718_v14 = vpop.f32.mrf.mxu0 }
  0xd7   :  { %v168_v20 = vmul.f32 %v2718_v14, %v2718_v14 }
  0xd8   :  { %v2720_v15 = vpop.f32.mrf.mxu0 }
  0xd9   :  { %v167_v21 = vmul.f32 %v2720_v15, %v2720_v15 }
  0xda   :  { %v2722_v16 = vpop.f32.mrf.mxu0 }
  0xdb   :  { %v170_v17 = vmul.f32 %v2722_v16, %v2722_v16 }
  0xdc   :  { %v2726_v18 = vpop.f32.mrf.mxu0 }
  0xdd   :  { %v169_v19 = vmul.f32 %v2726_v18, %v2726_v18  ;;  %199 = vmatprep.subr.mxu0 %v170_v17 }
  0xde   :  { %200 = vmatpush1.msra.mxu0 %v2722_v16 }
  0xdf   :  { %201 = vmatprep.subr.mxu0 %v169_v19 }
  0xe0   :  { %202 = vmatpush1.msra.mxu0 %v2726_v18 }
  0xe1   :  { %203 = vmatprep.subr.mxu0 %v168_v20 }
  0xe2   :  { %204 = vmatpush1.msra.mxu0 %v2718_v14 }
  0xe3   :  { %205 = vmatprep.subr.mxu0 %v167_v21 }
  0xe4   :  { %206 = vmatpush1.msra.mxu0 %v2720_v15 }
  0xe5   :  { %2068 = vmatmul.mubr.msk.f32.vlgmr.msra.gmra.mxu0 %vm171_vm1, %v2651_v22 }
  0xe6   :  { %2598 = shalt.err (!%p2595_p9)  }
  0xe7   :  { %39 = dma.hbm_to_vmem [thread:$0]  %s3137_s2, 10240, %s37_s29, [#allocation4] }
  0xe8   :  { %s2607_s9 = scalar_lea.vmem %s49_s5, 6144  ;;  %p2612_p11 = scmp.lt.s32.totalorder %s49_s5, %s49_s5 }
  0xe9   :  { %p2608_p10 = scmp.ne.s32.totalorder %s49_s5, %s2607_s9  ;;  %p2613_p12 = scmp.lt.s32.totalorder %s2607_s9, %s2607_s9 }
  0xeb   :  { %p2614_p13 = por %p2613_p12, %p2612_p11 }
  0xed   :  { %p2615_p0 = pnand %p2614_p13, %p2608_p10 }
  0xef   :  { %2618 = shalt.err (!%p2615_p0)  }
  0xf0   :  { %51 = dma.hbm_to_vmem [thread:$0]  %s3138_s3, 6144, %s49_s5, [#allocation4 + $0x1]  ;;  %v54_v47 = vld [vmem:[#allocation5 + $0x20] ss:$0 sm:$0xff]  ;;  %v2785_v48 = vsub.s32 0, %v2740_v24  ;;  %vm288_vm10 = vcmp.lt.s32.totalorder %v2740_v24, 2 }
  0xf1   :  { %v55_v51 = vld [vmem:[#allocation5 + $0x21] ss:$0 sm:$0xff]  ;;  %vm305_vm11 = vcmp.lt.s32.totalorder %v2740_v24, 1  ;;  %vm322_vm12 = vcmp.lt.s32.totalorder %v2740_v24, 7  ;;  %vm339_vm13 = vcmp.lt.s32.totalorder %v2740_v24, 6 }
 0x1a5   :  { %v241_v40 = vpop.f32.mrf.mxu0 }
 0x1a6   :  { %v246_v41 = vmul.f32 0.03125, %v241_v40 }
 0x1a7   :  { %v243_v42 = vpop.f32.mrf.mxu0 }
 0x1a8   :  { %v248_v43 = vmul.f32 %v246_v41, %v246_v41  ;;  %v247_v44 = vmul.f32 0.03125, %v243_v42 }
 0x1aa   :  { %v249_v45 = vsub.f32 %v247_v44, %v248_v43 }
 0x1ac   :  { %v250_v46 = vadd.f32 1e-05, %v249_v45 }
 0x1ae   :  { %2379 = vrsqrt.f32 %v250_v46 }
 0x1bb   :  { %v2380_v49 = vpop.eup %2379 }
 0x1bc   :  { %v252_v50 = vmul.f32 %v2380_v49, %v54_v47 }
 0x1be   :  { %v253_v52 = vmul.f32 %v252_v50, %v246_v41  ;;  %v258_v53 = vrot.slane %v252_v50, %v2785_v48 }
 0x1c0   :  { %v254_v54 = vsub.f32 %v55_v51, %v253_v52  ;;  %v259_v55 = vmul.f32 %v258_v53, %v2720_v15  ;;  %v260_v56 = vmul.f32 %v2718_v14, %v258_v53  ;;  %v261_v57 = vmul.f32 %v258_v53, %v2726_v18 }
 0x1c1   :  { %v262_v58 = vmul.f32 %v2722_v16, %v258_v53 }
 0x1c2   :  { %v266_v59 = vrot.slane %v254_v54, %v2785_v48 }
 0x1c4   :  { %v267_v60 = vadd.f32 %v266_v59, %v259_v55  ;;  %v268_v61 = vadd.f32 %v266_v59, %v260_v56  ;;  %v269_v62 = vadd.f32 %v266_v59, %v261_v57  ;;  %v270_v63 = vadd.f32 %v266_v59, %v262_v58 }
 0x1c6   :  { %v2793_v7 = vmax.f32 %v267_v60, 0.0  ;;  %v2795_v8 = vmax.f32 %v268_v61, 0.0  ;;  %v2797_v9 = vmax.f32 %v269_v62, 0.0  ;;  %v2799_v10 = vmax.f32 %v270_v63, 0.0 }
 0x1c8   :  { %v284_v11 = vrot.slane %v2793_v7, 6  ;;  %v285_v12 = vrot.slane %v2795_v8, 6  ;;  %v286_v14 = vrot.slane %v2797_v9, 6  ;;  %v287_v15 = vrot.slane %v2799_v10, 6 }
 0x1c9   :  { %v301_v16 = vrot.slane %v2793_v7, 7  ;;  %v302_v17 = vrot.slane %v2795_v8, 7  ;;  %v303_v18 = vrot.slane %v2797_v9, 7  ;;  %v304_v19 = vrot.slane %v2799_v10, 7 }
 0x1ca   :  { %v2813_v20 = vsel %vm288_vm10, %v286_v14, %v287_v15  ;;  %v2815_v21 = vsel %vm288_vm10, %v285_v12, %v286_v14  ;;  %v2817_v23 = vsel %vm288_vm10, %v284_v11, %v285_v12  ;;  %v2819_v25 = vsel %vm288_vm10, %v287_v15, %v284_v11 }
 0x1cb   :  { %v2823_v26 = vsel %vm305_vm11, %v303_v18, %v304_v19  ;;  %v2827_v27 = vsel %vm305_vm11, %v302_v17, %v303_v18  ;;  %v308_v28 = vsel %vm305_vm11, %v301_v16, %v302_v17  ;;  %v309_v29 = vsel %vm305_vm11, %v304_v19, %v301_v16 }
 0x1cc   :  { %v318_v30 = vrot.slane %v2793_v7, 1  ;;  %v319_v31 = vrot.slane %v2795_v8, 1  ;;  %v320_v40 = vrot.slane %v2797_v9, 1  ;;  %v321_v41 = vrot.slane %v2799_v10, 1 }
 0x1cd   :  { %v335_v42 = vrot.slane %v2793_v7, 2  ;;  %v336_v43 = vrot.slane %v2795_v8, 2  ;;  %v337_v44 = vrot.slane %v2797_v9, 2  ;;  %v338_v45 = vrot.slane %v2799_v10, 2 }
 0x1ce   :  { %v2843_v46 = vsel %vm322_vm12, %v320_v40, %v321_v41  ;;  %v324_v47 = vsel %vm322_vm12, %v319_v31, %v320_v40  ;;  %v325_v49 = vsel %vm322_vm12, %v318_v30, %v319_v31  ;;  %v2851_v50 = vsel %vm322_vm12, %v321_v41, %v318_v30 }
 0x1cf   :  { %v2855_v51 = vsel %vm339_vm13, %v337_v44, %v338_v45  ;;  %v2859_v52 = vsel %vm339_vm13, %v336_v43, %v337_v44  ;;  %v2863_v53 = vsel %vm339_vm13, %v335_v42, %v336_v43  ;;  %v2867_v54 = vsel %vm339_vm13, %v338_v45, %v335_v42 }
 0x1d0   :  { %v354_v55 = vpack.c.bf16 %v2795_v8, %v2793_v7  ;;  %v359_v56 = vpack.c.bf16 %v2799_v10, %v2797_v9 }
 0x1d1   :  { %2641 = dma.done.wait [#allocation4], 10240 }
 0x1d2   :  { %2642 = vsyncadd [#allocation4], 4294957056  ;;  %v2150_v57 = vpack.c.bf16 %v308_v28, %v309_v29  ;;  %v2162_v58 = vpack.c.bf16 %v324_v47, %v325_v49  ;;  %vm2654_vm14 = vmmov 1   ;;  %v2381_v61 = vld [vmem:[#allocation2 + $0x74] ss:$8 sps:$4 sm:$0xff]   ;;  %v2159_v37 = vpack.c.bf16 %v2813_v20, %v2815_v21 }
 0x1d3   :  { %vm2876_vm15 = vmpackc.low %vm2654_vm14, %vm2754_vm4  ;;  %v2383_v34 = vld [vmem:[#allocation2 + $0x174] ss:$8 sps:$4 sm:$0xff]   ;;  %846 = vmatprep.subr.bf16.mxu0 %v2381_v61  ;;  %v2385_v62 = vld [vmem:[#allocation2 + $0x70] ss:$8 sps:$4 sm:$0xff]  }
 0x1d4   :  { %2151 = vmatprep.mubr.msk.bf16.mxu0 %vm2876_vm15, %v2150_v57  ;;  %vm2885_vm0 = vmpackc.low %vm2762_vm6, %vm2654_vm14  ;;  %v2386_v63 = vld [vmem:[#allocation2 + $0x170] ss:$8 sps:$4 sm:$0xff]   ;;  %899 = vmatprep.subr.bf16.mxu1 %v2383_v34  ;;  %v2387_v11 = vld [vmem:[#allocation2 + $0x64] ss:$8 sps:$4 sm:$0xff]  }
 0x1d5   :  { %2163 = vmatprep.mubr.msk.bf16.mxu1 %vm2885_vm0, %v2162_v58  ;;  %847 = vmatpush1.bf16.msra.mxu0 %v2385_v62  ;;  %v2389_v12 = vld [vmem:[#allocation2 + $0x164] ss:$8 sps:$4 sm:$0xff]   ;;  %v2391_v14 = vld [vmem:[#allocation2 + $0x60] ss:$8 sps:$4 sm:$0xff]   ;;  %v2393_v15 = vld [vmem:[#allocation2 + $0x54] ss:$8 sps:$4 sm:$0xff]  }
 0x1d6   :  { %900 = vmatpush1.bf16.msra.mxu1 %v2386_v63  ;;  %848 = vmatprep.subr.bf16.mxu0 %v2387_v11  ;;  %v2392_v36 = vld [vmem:[#allocation2 + $0x160] ss:$8 sps:$4 sm:$0xff]   ;;  %v2395_v16 = vld [vmem:[#allocation2 + $0x154] ss:$8 sps:$4 sm:$0xff]   ;;  %v2397_v17 = vld [vmem:[#allocation2 + $0x50] ss:$8 sps:$4 sm:$0xff]  }
 0x1d7   :  { %901 = vmatprep.subr.bf16.mxu1 %v2389_v12  ;;  %v2398_v18 = vld [vmem:[#allocation2 + $0x150] ss:$8 sps:$4 sm:$0xff]   ;;  %v2399_v19 = vld [vmem:[#allocation2 + $0x44] ss:$8 sps:$4 sm:$0xff]   ;;  %v2403_v29 = vld [vmem:[#allocation2 + $0x40] ss:$8 sps:$4 sm:$0xff]  }
 0x1d8   :  { %v2401_v28 = vld [vmem:[#allocation2 + $0x144] ss:$8 sps:$4 sm:$0xff]   ;;  %v2404_v30 = vld [vmem:[#allocation2 + $0x140] ss:$8 sps:$4 sm:$0xff]   ;;  %v2405_v31 = vld [vmem:[#allocation2 + $0x34] ss:$8 sps:$4 sm:$0xff]  }
 0x1d9   :  { %849 = vmatpush1.bf16.msra.mxu0 %v2391_v14  ;;  %v2407_v40 = vld [vmem:[#allocation2 + $0x134] ss:$8 sps:$4 sm:$0xff]   ;;  %v2409_v41 = vld [vmem:[#allocation2 + $0x30] ss:$8 sps:$4 sm:$0xff]   ;;  %v2411_v43 = vld [vmem:[#allocation2 + $0x24] ss:$8 sps:$4 sm:$0xff]  }
 0x1da   :  { %902 = vmatpush1.bf16.msra.mxu1 %v2392_v36  ;;  %850 = vmatprep.subr.bf16.mxu0 %v2393_v15  ;;  %v2410_v42 = vld [vmem:[#allocation2 + $0x130] ss:$8 sps:$4 sm:$0xff]   ;;  %v2413_v44 = vld [vmem:[#allocation2 + $0x124] ss:$8 sps:$4 sm:$0xff]   ;;  %v2415_v45 = vld [vmem:[#allocation2 + $0x20] ss:$8 sps:$4 sm:$0xff]  }
 0x1db   :  { %903 = vmatprep.subr.bf16.mxu1 %v2395_v16  ;;  %v2416_v47 = vld [vmem:[#allocation2 + $0x120] ss:$8 sps:$4 sm:$0xff]   ;;  %v2417_v49 = vld [vmem:[#allocation2 + $0x14] ss:$8 sps:$4 sm:$0xff]   ;;  %v2421_v58 = vld [vmem:[#allocation2 + $0x10] ss:$8 sps:$4 sm:$0xff]  }
 0x1dc   :  { %v2419_v57 = vld [vmem:[#allocation2 + $0x114] ss:$8 sps:$4 sm:$0xff]   ;;  %v2422_v61 = vld [vmem:[#allocation2 + $0x110] ss:$8 sps:$4 sm:$0xff]   ;;  %v2423_v34 = vld [vmem:[#allocation2 + $0x4] ss:$8 sps:$4 sm:$0xff]  }
 0x1dd   :  { %851 = vmatpush1.bf16.msra.mxu0 %v2397_v17  ;;  %v2425_v62 = vld [vmem:[#allocation2 + $0x104] ss:$8 sps:$4 sm:$0xff]   ;;  %v2427_v63 = vld [vmem:[#allocation2] ss:$8 sps:$4 sm:$0xff]   ;;  %v2429_v12 = vld [vmem:[#allocation2 + $0xf4] ss:$8 sps:$4 sm:$0xff]  }
 0x1de   :  { %904 = vmatpush1.bf16.msra.mxu1 %v2398_v18  ;;  %852 = vmatprep.subr.bf16.mxu0 %v2399_v19  ;;  %v2428_v11 = vld [vmem:[#allocation2 + $0x100] ss:$8 sps:$4 sm:$0xff]   ;;  %v2431_v14 = vld [vmem:[#allocation2 + $0x1f4] ss:$8 sps:$4 sm:$0xff]   ;;  %v2433_v36 = vld [vmem:[#allocation2 + $0xf0] ss:$8 sps:$4 sm:$0xff]  }
 0x1df   :  { %905 = vmatprep.subr.bf16.mxu1 %v2401_v28  ;;  %v2434_v15 = vld [vmem:[#allocation2 + $0x1f0] ss:$8 sps:$4 sm:$0xff]   ;;  %v2435_v16 = vld [vmem:[#allocation2 + $0xe4] ss:$8 sps:$4 sm:$0xff]   ;;  %v2439_v18 = vld [vmem:[#allocation2 + $0xe0] ss:$8 sps:$4 sm:$0xff]  }
 0x1e0   :  { %v2437_v17 = vld [vmem:[#allocation2 + $0x1e4] ss:$8 sps:$4 sm:$0xff]   ;;  %v2440_v19 = vld [vmem:[#allocation2 + $0x1e0] ss:$8 sps:$4 sm:$0xff]   ;;  %v2441_v28 = vld [vmem:[#allocation2 + $0xd4] ss:$8 sps:$4 sm:$0xff]  }
 0x1e1   :  { %853 = vmatpush1.bf16.msra.mxu0 %v2403_v29  ;;  %v2443_v29 = vld [vmem:[#allocation2 + $0x1d4] ss:$8 sps:$4 sm:$0xff]   ;;  %vm2152_vm4 = vmpackc.low %vm2654_vm14, %vm2746_vm2  ;;  %v2480_v35 = vld [vmem:[#allocation2 + $0x260] ss:$8 sps:$4 sm:$0xff]  }
 0x1e2   :  { %906 = vmatpush1.bf16.msra.mxu1 %v2404_v30  ;;  %854 = vmatprep.subr.bf16.mxu0 %v2405_v31  ;;  %v2445_v30 = vld [vmem:[#allocation2 + $0xd0] ss:$8 sps:$4 sm:$0xff]   ;;  %vm2901_vm6 = vmpackc.low %vm2654_vm14, %vm2758_vm5  ;;  %v2488_v7 = vld [vmem:[#allocation2 + $0x244] ss:$8 sps:$4 sm:$0xff]  }
 0x1e3   :  { %907 = vmatprep.subr.bf16.mxu1 %v2407_v40  ;;  %v2446_v31 = vld [vmem:[#allocation2 + $0x1d0] ss:$8 sps:$4 sm:$0xff]   ;;  %v2447_v40 = vld [vmem:[#allocation2 + $0xc4] ss:$8 sps:$4 sm:$0xff]   ;;  %vm2910_vm2 = vmpackc.low %vm2766_vm7, %vm2654_vm14 }
 0x1e4   :  { %vm2158_vm5 = vmpackc.low %vm2654_vm14, %vm2750_vm3  ;;  %v2486_v8 = vld [vmem:[#allocation2 + $0x240] ss:$8 sps:$4 sm:$0xff]   ;;  %v2489_v20 = vld [vmem:[#allocation2 + $0x230] ss:$8 sps:$4 sm:$0xff]  }
 0x1e5   :  { %855 = vmatpush1.bf16.msra.mxu0 %v2409_v41  ;;  %v2449_v41 = vld [vmem:[#allocation2 + $0x1c4] ss:$8 sps:$4 sm:$0xff]   ;;  %v2492_v21 = vld [vmem:[#allocation2 + $0x220] ss:$8 sps:$4 sm:$0xff]   ;;  %vm2167_vm3 = vmpackc.low %vm2770_vm8, %vm2654_vm14 }
 0x1e6   :  { %908 = vmatpush1.bf16.msra.mxu1 %v2410_v42  ;;  %856 = vmatprep.subr.bf16.mxu0 %v2411_v43  ;;  %v2451_v42 = vld [vmem:[#allocation2 + $0xc0] ss:$8 sps:$4 sm:$0xff]   ;;  %v2494_v33 = vld [vmem:[#allocation2 + $0x224] ss:$8 sps:$4 sm:$0xff]   ;;  %vm2170_vm7 = vmpackc.low %vm2774_vm9, %vm2654_vm14 }
 0x1e7   :  { %909 = vmatprep.subr.bf16.mxu1 %v2413_v44  ;;  %v2452_v43 = vld [vmem:[#allocation2 + $0x1c0] ss:$8 sps:$4 sm:$0xff]   ;;  %v2453_v44 = vld [vmem:[#allocation2 + $0xb4] ss:$8 sps:$4 sm:$0xff]   ;;  %v2500_v9 = vld [vmem:[#allocation2 + $0x204] ss:$8 sps:$4 sm:$0xff]  }
 0x1e8   :  { %v2498_v10 = vld [vmem:[#allocation2 + $0x200] ss:$8 sps:$4 sm:$0xff]  }
 0x1e9   :  { %857 = vmatpush1.bf16.msra.mxu0 %v2415_v45  ;;  %v2455_v45 = vld [vmem:[#allocation2 + $0x1b4] ss:$8 sps:$4 sm:$0xff]  }
 0x1ea   :  { %910 = vmatpush1.bf16.msra.mxu1 %v2416_v47  ;;  %858 = vmatprep.subr.bf16.mxu0 %v2417_v49  ;;  %v2457_v47 = vld [vmem:[#allocation2 + $0xb0] ss:$8 sps:$4 sm:$0xff]  }
 0x1eb   :  { %911 = vmatprep.subr.bf16.mxu1 %v2419_v57  ;;  %v2458_v49 = vld [vmem:[#allocation2 + $0x1b0] ss:$8 sps:$4 sm:$0xff]   ;;  %v2459_v57 = vld [vmem:[#allocation2 + $0xa4] ss:$8 sps:$4 sm:$0xff]  }
 0x1ed   :  { %859 = vmatpush1.bf16.msra.mxu0 %v2421_v58  ;;  %v2461_v58 = vld [vmem:[#allocation2 + $0x1a4] ss:$8 sps:$4 sm:$0xff]  }
 0x1ee   :  { %912 = vmatpush1.bf16.msra.mxu1 %v2422_v61  ;;  %860 = vmatprep.subr.bf16.mxu0 %v2423_v34  ;;  %v2463_v61 = vld [vmem:[#allocation2 + $0xa0] ss:$8 sps:$4 sm:$0xff]  }
 0x1ef   :  { %913 = vmatprep.subr.bf16.mxu1 %v2425_v62  ;;  %v2464_v34 = vld [vmem:[#allocation2 + $0x1a0] ss:$8 sps:$4 sm:$0xff]   ;;  %v2465_v62 = vld [vmem:[#allocation2 + $0x94] ss:$8 sps:$4 sm:$0xff]  }
 0x1f1   :  { %861 = vmatpush1.bf16.msra.mxu0 %v2427_v63  ;;  %v2467_v63 = vld [vmem:[#allocation2 + $0x194] ss:$8 sps:$4 sm:$0xff]  }
 0x1f2   :  { %914 = vmatpush1.bf16.msra.mxu1 %v2428_v11  ;;  %862 = vmatprep.subr.bf16.mxu0 %v2429_v12  ;;  %v2469_v11 = vld [vmem:[#allocation2 + $0x90] ss:$8 sps:$4 sm:$0xff]  }
 0x1f3   :  { %915 = vmatprep.subr.bf16.mxu1 %v2431_v14  ;;  %v2470_v12 = vld [vmem:[#allocation2 + $0x190] ss:$8 sps:$4 sm:$0xff]   ;;  %v2471_v14 = vld [vmem:[#allocation2 + $0x84] ss:$8 sps:$4 sm:$0xff]  }
 0x1f5   :  { %863 = vmatpush2.bf16.msra.mxu0 %v2433_v36  ;;  %v2473_v36 = vld [vmem:[#allocation2 + $0x184] ss:$8 sps:$4 sm:$0xff]  }
 0x1f6   :  { %916 = vmatpush2.bf16.msra.mxu1 %v2434_v15  ;;  %864 = vmatprep.subr.bf16.mxu0 %v2435_v16  ;;  %v2475_v15 = vld [vmem:[#allocation2 + $0x80] ss:$8 sps:$4 sm:$0xff]  }
 0x1f7   :  { %917 = vmatprep.subr.bf16.mxu1 %v2437_v17  ;;  %v2476_v16 = vld [vmem:[#allocation2 + $0x180] ss:$8 sps:$4 sm:$0xff]   ;;  %v2479_v17 = vld [vmem:[#allocation2 + $0x274] ss:$8 sps:$4 sm:$0xff]  }
 0x1f9   :  { %865 = vmatpush2.bf16.msra.mxu0 %v2439_v18  ;;  %v2153_v18 = vpack.c.bf16 %v2817_v23, %v2819_v25  ;;  %v2165_v23 = vpack.c.bf16 %v2851_v50, %v2843_v46  ;;  %v2485_v25 = vld [vmem:[#allocation2 + $0x254] ss:$8 sps:$4 sm:$0xff]  }
 0x1fa   :  { %918 = vmatpush2.bf16.msra.mxu1 %v2440_v19  ;;  %866 = vmatprep.subr.bf16.mxu0 %v2441_v28  ;;  %v2477_v19 = vld [vmem:[#allocation2 + $0x270] ss:$8 sps:$4 sm:$0xff]   ;;  %v2156_v28 = vpack.c.bf16 %v2823_v26, %v2827_v27  ;;  %v2655_v27 = vmov 0   ;;  %v2491_v46 = vld [vmem:[#allocation2 + $0x234] ss:$8 sps:$4 sm:$0xff]  }
 0x1fb   :  { %919 = vmatprep.subr.bf16.mxu1 %v2443_v29  ;;  %v2482_v29 = vld [vmem:[#allocation2 + $0x264] ss:$8 sps:$4 sm:$0xff]   ;;  %v2483_v26 = vld [vmem:[#allocation2 + $0x250] ss:$8 sps:$4 sm:$0xff]   ;;  %v2497_v50 = vld [vmem:[#allocation2 + $0x214] ss:$8 sps:$4 sm:$0xff]  }
 0x1fd   :  { %867 = vmatpush2.bf16.msra.mxu0 %v2445_v30 }
 0x1fe   :  { %920 = vmatpush2.bf16.msra.mxu1 %v2446_v31  ;;  %868 = vmatprep.subr.bf16.mxu0 %v2447_v40  ;;  %v2171_v31 = vpack.c.bf16 %v2867_v54, %v2855_v51 }
 0x1ff   :  { %921 = vmatprep.subr.bf16.mxu1 %v2449_v41 }
 0x201   :  { %869 = vmatpush2.bf16.msra.mxu0 %v2451_v42 }
 0x202   :  { %922 = vmatpush2.bf16.msra.mxu1 %v2452_v43  ;;  %870 = vmatprep.subr.bf16.mxu0 %v2453_v44 }
 0x203   :  { %923 = vmatprep.subr.bf16.mxu1 %v2455_v45 }
 0x205   :  { %871 = vmatpush2.bf16.msra.mxu0 %v2457_v47 }
 0x206   :  { %924 = vmatpush2.bf16.msra.mxu1 %v2458_v49  ;;  %872 = vmatprep.subr.bf16.mxu0 %v2459_v57 }
 0x207   :  { %925 = vmatprep.subr.bf16.mxu1 %v2461_v58 }
 0x209   :  { %873 = vmatpush2.bf16.msra.mxu0 %v2463_v61 }
 0x20a   :  { %926 = vmatpush2.bf16.msra.mxu1 %v2464_v34  ;;  %874 = vmatprep.subr.bf16.mxu0 %v2465_v62 }
 0x20b   :  { %927 = vmatprep.subr.bf16.mxu1 %v2467_v63 }
 0x20d   :  { %875 = vmatpush2.bf16.msra.mxu0 %v2469_v11 }
 0x20e   :  { %928 = vmatpush2.bf16.msra.mxu1 %v2470_v12  ;;  %876 = vmatprep.subr.bf16.mxu0 %v2471_v14 }
 0x20f   :  { %929 = vmatprep.subr.bf16.mxu1 %v2473_v36 }
 0x211   :  { %877 = vmatpush2.bf16.msra.mxu0 %v2475_v15 }
 0x212   :  { %930 = vmatpush2.bf16.msra.mxu1 %v2476_v16  ;;  %952 = vmatprep.subr.bf16.mxu0 %v2479_v17 }
 0x214   :  { %2154 = vmatmul.mubr.msk.bf16.vlgmr.msra.gmra.mxu0 %vm2152_vm4, %v2153_v18 }
 0x215   :  { %932 = vmatmul.mubr.bf16.vlgmr.msra.gmra.mxu1 %v354_v55  ;;  %953 = vmatpush1.bf16.msra.mxu0 %v2477_v19  ;;  %v2495_v55 = vld [vmem:[#allocation2 + $0x210] ss:$8 sps:$4 sm:$0xff]  }
 0x216   :  { %2157 = vmatprep.mubr.msk.bf16.mxu0 %vm2901_vm6, %v2156_v28  ;;  %954 = vmatprep.subr.bf16.mxu0 %v2482_v29 }
 0x217   :  { %2166 = vmatprep.mubr.msk.bf16.mxu1 %vm2910_vm2, %v2165_v23 }
 0x219   :  { %955 = vmatpush1.bf16.msra.mxu0 %v2480_v35 }
 0x21a   :  { %956 = vmatprep.subr.bf16.mxu0 %v2485_v25 }
 0x21c   :  { %2160 = vmatmul.mubr.msk.bf16.gmra.mxu0 %vm2158_vm5, %v2159_v37 }
 0x21d   :  { %942 = vmatmul.mubr.bf16.gmra.mxu1 %v359_v56  ;;  %957 = vmatpush1.bf16.msra.mxu0 %v2483_v26  ;;  %v2168_v56 = vpack.c.bf16 %v2859_v52, %v2863_v53 }
 0x21e   :  { %984 = vmatprep.mubr.bf16.mxu0 %v2655_v27  ;;  %958 = vmatprep.subr.bf16.mxu0 %v2488_v7 }
 0x21f   :  { %1077 = vmatprep.mubr.f32.mxu1 %v2650_v13 }
 0x221   :  { %959 = vmatpush1.bf16.msra.mxu0 %v2486_v8 }
 0x222   :  { %960 = vmatprep.subr.bf16.mxu0 %v2491_v46 }
 0x225   :  { %961 = vmatpush1.bf16.msra.mxu0 %v2489_v20 }
 0x226   :  { %962 = vmatprep.subr.bf16.mxu0 %v2494_v33 }
 0x229   :  { %963 = vmatpush1.bf16.msra.mxu0 %v2492_v21 }
 0x22a   :  { %964 = vmatprep.subr.bf16.mxu0 %v2497_v50 }
 0x22d   :  { %965 = vmatpush1.bf16.msra.mxu0 %v2495_v55 }
 0x22e   :  { %966 = vmatprep.subr.bf16.mxu0 %v2500_v9 }
 0x231   :  { %967 = vmatpush1.bf16.msra.mxu0 %v2498_v10 }
 0x234   :  { %2169 = vmatmul.mubr.msk.bf16.vlgmr.msra.gmra.mxu0 %vm2167_vm3, %v2168_v56 }
 0x235   :  { %994 = vmatprep.mubr.bf16.mxu0 %v2655_v27 }
 0x23c   :  { %2172 = vmatmul.mubr.msk.bf16.gmra.mxu0 %vm2170_vm7, %v2171_v31 }
 0x2d4   :  { %v880_v40 = vpop.f32.mrf.mxu0 }
 0x2d5   :  { %v933_v43 = vpop.f32.mrf.mxu1 }
 0x2d6   :  { %v882_v41 = vpop.f32.mrf.mxu0  ;;  %v934_v7 = vadd.f32 %v933_v43, %v880_v40 }
 0x2d7   :  { %v935_v44 = vpop.f32.mrf.mxu1 }
 0x2d8   :  { %v884_v42 = vpop.f32.mrf.mxu0  ;;  %v936_v37 = vadd.f32 %v935_v44, %v882_v41 }
 0x2d9   :  { %v937_v38 = vpop.f32.mrf.mxu1 }
 0x2da   :  { %v886_v52 = vpop.f32.mrf.mxu0  ;;  %v938_v35 = vadd.f32 %v937_v38, %v884_v42 }
 0x2db   :  { %v939_v49 = vpop.f32.mrf.mxu1 }
 0x2dc   :  { %v890_v53 = vpop.f32.mrf.mxu0  ;;  %v940_v29 = vadd.f32 %v939_v49, %v886_v52 }
 0x2dd   :  { %v943_v57 = vpop.f32.mrf.mxu1 }
 0x2de   :  { %v892_v45 = vpop.f32.mrf.mxu0  ;;  %v944_v19 = vadd.f32 %v943_v57, %v890_v53 }
 0x2df   :  { %v945_v51 = vpop.f32.mrf.mxu1 }
 0x2e0   :  { %v894_v47 = vpop.f32.mrf.mxu0  ;;  %v946_v17 = vadd.f32 %v945_v51, %v892_v45 }
 0x2e1   :  { %v947_v39 = vpop.f32.mrf.mxu1 }
 0x2e2   :  { %v896_v58 = vpop.f32.mrf.mxu0  ;;  %v948_v15 = vadd.f32 %v947_v39, %v894_v47 }
 0x2e3   :  { %v949_v11 = vpop.f32.mrf.mxu1 }
 0x2e4   :  { %v950_v36 = vadd.f32 %v949_v11, %v896_v58 }
 0x2f4   :  { %v986_v61 = vpop.f32.mrf.mxu0 }
 0x2f5   :  { %v987_v46 = vadd.f32 %v986_v61, %v934_v7  ;;  %v2656_v61 = vmov 1966171168  }
 0x2f6   :  { %v988_v54 = vpop.f32.mrf.mxu0  ;;  %v1171_v51 = vunpack.c.l.s4 %v2656_v61 }
 0x2f7   :  { %v989_v27 = vadd.f32 %v988_v54, %v936_v37  ;;  %v1005_v56 = vmul.f32 %v987_v46, %v987_v46 }
 0x2f8   :  { %v990_v34 = vpop.f32.mrf.mxu0  ;;  %v1172_v54 = vunpack.c.0.s8 %v1171_v51 }
 0x2f9   :  { %v2953_v8 = vadd.f32 %v990_v34, %v938_v35  ;;  %v1006_v10 = vmul.f32 %v989_v27, %v989_v27 }
 0x2fa   :  { %v992_v62 = vpop.f32.mrf.mxu0  ;;  %v1175_v39 = vsub.s32 %v1172_v54, %v2740_v24 }
 0x2fb   :  { %v2950_v26 = vadd.f32 %v992_v62, %v940_v29  ;;  %v1007_v9 = vmul.f32 %v2953_v8, %v2953_v8 }
 0x2fc   :  { %v996_v63 = vpop.f32.mrf.mxu0 }
 0x2fd   :  { %v2947_v25 = vadd.f32 %v996_v63, %v944_v19  ;;  %v1008_v55 = vmul.f32 %v2950_v26, %v2950_v26 }
 0x2fe   :  { %v998_v12 = vpop.f32.mrf.mxu0 }
 0x2ff   :  { %v2944_v23 = vadd.f32 %v998_v12, %v946_v17  ;;  %v1009_v50 = vmul.f32 %v2947_v25, %v2947_v25 }
 0x300   :  { %v1000_v14 = vpop.f32.mrf.mxu0 }
 0x301   :  { %v2942_v28 = vadd.f32 %v1000_v14, %v948_v15  ;;  %v1010_v21 = vmul.f32 %v2944_v23, %v2944_v23  ;;  %v1193_v14 = vsub.s32 1, %v2740_v24 }
 0x302   :  { %v1002_v16 = vpop.f32.mrf.mxu0 }
 0x303   :  { %v2940_v18 = vadd.f32 %v1002_v16, %v950_v36  ;;  %v1011_v33 = vmul.f32 %v2942_v28, %v2942_v28 }
 0x305   :  { %1037 = vmatprep.subr.mxu1 %v2940_v18  ;;  %v1012_v20 = vmul.f32 %v2940_v18, %v2940_v18 }
 0x306   :  { %1038 = vmatpush1.msra.mxu1 %v2942_v28 }
 0x307   :  { %1039 = vmatprep.subr.mxu1 %v2944_v23 }
 0x308   :  { %1040 = vmatpush1.msra.mxu1 %v2947_v25 }
 0x309   :  { %1041 = vmatprep.subr.mxu1 %v2950_v26 }
 0x30a   :  { %1042 = vmatpush1.msra.mxu1 %v2953_v8 }
 0x30b   :  { %1043 = vmatprep.subr.mxu1 %v989_v27 }
 0x30c   :  { %1044 = vmatpush1.msra.mxu1 %v987_v46 }
 0x30d   :  { %1108 = vmatprep.subr.mxu1 %v1012_v20  ;;  %2173 = vmatmul.mubr.msk.f32.vlgmr.msra.gmra.mxu1 %vm171_vm1, %v2651_v22 }
 0x30e   :  { %1109 = vmatpush1.msra.mxu1 %v1011_v33  ;;  %1148 = vmatprep.mubr.f32.mxu1 %v2650_v13 }
 0x30f   :  { %1110 = vmatprep.subr.mxu1 %v1010_v21 }
 0x310   :  { %1111 = vmatpush1.msra.mxu1 %v1009_v50 }
 0x311   :  { %1112 = vmatprep.subr.mxu1 %v1008_v55 }
 0x312   :  { %1113 = vmatpush1.msra.mxu1 %v1007_v9 }
 0x313   :  { %1114 = vmatprep.subr.mxu1 %v1006_v10 }
 0x314   :  { %1115 = vmatpush1.msra.mxu1 %v1005_v56 }
 0x315   :  { %2174 = vmatmul.mubr.msk.f32.vlgmr.msra.gmra.mxu1 %vm171_vm1, %v2651_v22 }
 0x3cd   :  { %v1079_v31 = vpop.f32.mrf.mxu1 }
 0x3ce   :  { %v1155_v41 = vmul.f32 0.03125, %v1079_v31 }
 0x3cf   :  { %v1081_v40 = vpop.f32.mrf.mxu1 }
 0x3d0   :  { %v1156_v42 = vmul.f32 0.03125, %v1081_v40  ;;  %v1159_v52 = vmul.f32 %v1155_v41, %v1155_v41 }
 0x3d2   :  { %v1160_v45 = vmul.f32 %v1156_v42, %v1156_v42 }
 0x3d5   :  { %v1150_v43 = vpop.f32.mrf.mxu1 }
 0x3d6   :  { %v1157_v53 = vmul.f32 0.03125, %v1150_v43 }
 0x3d7   :  { %v1152_v44 = vpop.f32.mrf.mxu1 }
 0x3d8   :  { %v1161_v38 = vsub.f32 %v1157_v53, %v1159_v52  ;;  %v1158_v47 = vmul.f32 0.03125, %v1152_v44 }
 0x3da   :  { %v1163_v49 = vadd.f32 1e-05, %v1161_v38  ;;  %v1162_v57 = vsub.f32 %v1158_v47, %v1160_v45 }
 0x3dc   :  { %v1164_v58 = vadd.f32 1e-05, %v1162_v57  ;;  %2501 = vrsqrt.f32 %v1163_v49 }
 0x3de   :  { %2503 = vrsqrt.f32 %v1164_v58 }
 0x3e9   :  { %v2502_v34 = vpop.eup %2501 }
 0x3eb   :  { %v2504_v62 = vpop.eup %2503 }
 0x3ec   :  { %v1169_v63 = vcombine.low %v2502_v34, %v2504_v62 }
 0x3ee   :  { %v1176_v11 = vrot.slane %v1169_v63, %v1175_v39 }
 0x3f0   :  { %v1183_v12 = vrot.slane %v1176_v11, %v1175_v39 }
 0x3f2   :  { %v1185_v36 = vmul.f32 %v1183_v12, %v2687_v0 }
 0x3f4   :  { %v1190_v15 = vrot.slane %v1185_v36, %v2785_v48  ;;  %v1194_v16 = vrot.slane %v1185_v36, %v1193_v14 }
 0x3f6   :  { %v1197_v17 = vmul.f32 %v1190_v15, %v1155_v41  ;;  %v1198_v19 = vmul.f32 %v1194_v16, %v1156_v42  ;;  %v1218_v20 = vmul.f32 %v1190_v15, %v987_v46  ;;  %v1219_v33 = vmul.f32 %v1194_v16, %v989_v27 }
 0x3f7   :  { %v1220_v21 = vmul.f32 %v1190_v15, %v2953_v8  ;;  %v1221_v50 = vmul.f32 %v1194_v16, %v2950_v26  ;;  %v1222_v0 = vmul.f32 %v1190_v15, %v2947_v25  ;;  %v1223_v10 = vmul.f32 %v1194_v16, %v2944_v23 }
 0x3f8   :  { %v1201_v29 = vcombine.low %v1197_v17, %v1198_v19  ;;  %v1224_v56 = vmul.f32 %v1190_v15, %v2942_v28  ;;  %v1225_v31 = vmul.f32 %v1194_v16, %v2940_v18 }
 0x3fa   :  { %v1208_v35 = vrot.slane %v1201_v29, %v1175_v39 }
 0x3fc   :  { %v1215_v37 = vrot.slane %v1208_v35, %v1175_v39 }
 0x3fe   :  { %v1217_v7 = vsub.f32 %v2689_v1, %v1215_v37 }
 0x400   :  { %v1230_v55 = vrot.slane %v1217_v7, %v2785_v48  ;;  %v1234_v9 = vrot.slane %v1217_v7, %v1193_v14 }
 0x402   :  { %v1237_v40 = vadd.f32 %v1230_v55, %v1218_v20  ;;  %v1238_v41 = vadd.f32 %v1234_v9, %v1219_v33  ;;  %v1239_v1 = vadd.f32 %v1230_v55, %v1220_v21  ;;  %v1240_v46 = vadd.f32 %v1234_v9, %v1221_v50 }
 0x403   :  { %v1241_v27 = vadd.f32 %v1230_v55, %v1222_v0  ;;  %v1242_v42 = vadd.f32 %v1234_v9, %v1223_v10  ;;  %v1243_v8 = vadd.f32 %v1230_v55, %v1224_v56  ;;  %v1244_v43 = vadd.f32 %v1234_v9, %v1225_v31 }
 0x404   :  { %v2987_v26 = vmax.f32 %v1237_v40, 0.0  ;;  %v1246_v52 = vmax.f32 %v1238_v41, 0.0  ;;  %v2989_v53 = vmax.f32 %v1239_v1, 0.0  ;;  %v1248_v25 = vmax.f32 %v1240_v46, 0.0 }
 0x405   :  { %v2991_v44 = vmax.f32 %v1241_v27, 0.0  ;;  %v2993_v23 = vmax.f32 %v1242_v42, 0.0  ;;  %v2995_v28 = vmax.f32 %v1243_v8, 0.0  ;;  %v2997_v18 = vmax.f32 %v1244_v43, 0.0 }
 0x406   :  { %v1253_v45 = vrot.slane %v2987_v26, 7  ;;  %v1254_v38 = vrot.slane %v1246_v52, 7  ;;  %v1255_v47 = vrot.slane %v2989_v53, 7  ;;  %v1256_v49 = vrot.slane %v1248_v25, 7 }
 0x407   :  { %v1257_v57 = vrot.slane %v2991_v44, 7  ;;  %v1258_v58 = vrot.slane %v2993_v23, 7  ;;  %v1259_v61 = vrot.slane %v2995_v28, 7  ;;  %v1260_v51 = vrot.slane %v2997_v18, 7 }
 0x408   :  { %v3007_v54 = vsel %vm305_vm11, %v1253_v45, %v1255_v47  ;;  %v1266_v34 = vsel %vm305_vm11, %v1254_v38, %v1256_v49  ;;  %v1277_v39 = vrot.slane %v2987_v26, 1  ;;  %v1278_v62 = vrot.slane %v1246_v52, 1 }
 0x409   :  { %v3014_v63 = vsel %vm305_vm11, %v1257_v57, %v1259_v61  ;;  %v3018_v11 = vsel %vm305_vm11, %v1258_v58, %v1260_v51  ;;  %v3022_v12 = vsel %vm305_vm11, %v1255_v47, %v1257_v57  ;;  %v3026_v14 = vsel %vm305_vm11, %v1256_v49, %v1258_v58 }
 0x40a   :  { %v3030_v36 = vsel %vm305_vm11, %v1259_v61, %v1253_v45  ;;  %v1268_v15 = vsel %vm305_vm11, %v1260_v51, %v1254_v38  ;;  %v1279_v16 = vrot.slane %v2989_v53, 1  ;;  %v1280_v17 = vrot.slane %v1248_v25, 1 }
 0x40b   :  { %v1281_v19 = vrot.slane %v2991_v44, 1  ;;  %v1282_v29 = vrot.slane %v2993_v23, 1  ;;  %v1283_v35 = vrot.slane %v2995_v28, 1  ;;  %v1284_v37 = vrot.slane %v2997_v18, 1 }
 0x40c   :  { %v3041_v7 = vsel %vm322_vm12, %v1277_v39, %v1279_v16  ;;  %v3045_v20 = vsel %vm322_vm12, %v1278_v62, %v1280_v17  ;;  %v1303_v33 = vpack.c.bf16 %v2989_v53, %v2987_v26  ;;  %v1304_v21 = vpack.c.bf16 %v1248_v25, %v1246_v52 }
 0x40d   :  { %v3051_v50 = vsel %vm322_vm12, %v1281_v19, %v1283_v35  ;;  %v3055_v55 = vsel %vm322_vm12, %v1282_v29, %v1284_v37  ;;  %v3059_v9 = vsel %vm322_vm12, %v1279_v16, %v1281_v19  ;;  %v3063_v0 = vsel %vm322_vm12, %v1280_v17, %v1282_v29 }
 0x40e   :  { %v3067_v10 = vsel %vm322_vm12, %v1283_v35, %v1277_v39  ;;  %v3071_v56 = vsel %vm322_vm12, %v1284_v37, %v1278_v62  ;;  %v1309_v31 = vpack.c.bf16 %v2995_v28, %v2991_v44  ;;  %v1310_v40 = vpack.c.bf16 %v2997_v18, %v2993_v23 }
 0x40f   :  { %2643 = dma.done.wait [#allocation4 + $0x1], 6144 }
 0x410   :  { %2644 = vsyncadd [#allocation4 + $0x1], 4294961152  ;;  %v2224_v41 = vpack.c.bf16 %v1266_v34, %v1268_v15  ;;  %1782 = vmatprep.mubr.bf16.mxu0 %v1304_v21  ;;  %v2505_v1 = vld [vmem:[#allocation3 + $0x78] sm:$0xff]   ;;  %v2509_v42 = vld [vmem:[#allocation3 + $0x70] sm:$0xff]   ;;  %v2236_v26 = vpack.c.bf16 %v3063_v0, %v3045_v20  ;;  %v2239_v20 = vpack.c.bf16 %v3059_v9, %v3041_v7  ;;  %v2245_v0 = vpack.c.bf16 %v3067_v10, %v3051_v50  ;;  %s2658_s2 = smov [#allocation8]  }
 0x411   :  { %v2506_v46 = vld [vmem:[#allocation3 + $0xf8] sm:$0xff]   ;;  %2257 = vmatprep.subr.bf16.mxu1 %v2505_v1  ;;  %v2510_v8 = vld [vmem:[#allocation3 + $0xf0] sm:$0xff]   ;;  %v2513_v25 = vld [vmem:[#allocation3 + $0x68] sm:$0xff]   ;;  %vm2657_vm8 = vmmov 0   ;;  %s2042_s3 = sshll.u32 %s2658_s2, 4  ;;  %s2043_s3 = int_to_ptr.vmem [resolvable:$true] %s2042_s3 }
 0x412   :  { %2225 = vmatprep.mubr.msk.bf16.mxu1 %vm2876_vm15, %v2224_v41  ;;  %v2507_v27 = vld [vmem:[#allocation3 + $0x38] sm:$0xff]   ;;  %2285 = vmatprep.subr.bf16.mxu0 %v2506_v46  ;;  %v2511_v43 = vld [vmem:[#allocation3 + $0x30] sm:$0xff]   ;;  %v2514_v45 = vld [vmem:[#allocation3 + $0xe8] sm:$0xff]   ;;  %s2619_s12 = scalar_lea.vmem %s2043_s3, 128  ;;  %p2624_p2 = scmp.lt.s32.totalorder %s2043_s3, %s2043_s3 }
 0x413   :  { %v2508_v24 = vld [vmem:[#allocation3 + $0xb8] sm:$0xff]   ;;  %2258 = vmatpush3.bf16.msra.mxu1 %v2507_v27  ;;  %v2512_v52 = vld [vmem:[#allocation3 + $0xb0] sm:$0xff]   ;;  %v2515_v38 = vld [vmem:[#allocation3 + $0x28] sm:$0xff]   ;;  %p2620_p1 = scmp.ne.s32.totalorder %s2043_s3, %s2619_s12  ;;  %p2625_p3 = scmp.lt.s32.totalorder %s2619_s12, %s2619_s12 }
 0x414   :  { %2286 = vmatpush3.bf16.msra.mxu0 %v2508_v24  ;;  %2259 = vmatprep.subr.bf16.mxu1 %v2509_v42  ;;  %v2516_v47 = vld [vmem:[#allocation3 + $0xa8] sm:$0xff]   ;;  %v2517_v49 = vld [vmem:[#allocation3 + $0x60] sm:$0xff]   ;;  %v2521_v51 = vld [vmem:[#allocation3 + $0x58] sm:$0xff]   ;;  %v2227_v24 = vpack.c.bf16 %v3007_v54, %v3030_v36 }
 0x415   :  { %2287 = vmatprep.subr.bf16.mxu0 %v2510_v8  ;;  %v2518_v57 = vld [vmem:[#allocation3 + $0xe0] sm:$0xff]   ;;  %v2522_v34 = vld [vmem:[#allocation3 + $0xd8] sm:$0xff]   ;;  %v2525_v15 = vld [vmem:[#allocation3 + $0x50] sm:$0xff]   ;;  %p2626_p4 = por %p2625_p3, %p2624_p2 }
 0x416   :  { %v2519_v58 = vld [vmem:[#allocation3 + $0x20] sm:$0xff]   ;;  %v2523_v39 = vld [vmem:[#allocation3 + $0x18] sm:$0xff]   ;;  %v2526_v16 = vld [vmem:[#allocation3 + $0xd0] sm:$0xff]  }
 0x417   :  { %2260 = vmatpush3.bf16.msra.mxu1 %v2511_v43  ;;  %v2520_v61 = vld [vmem:[#allocation3 + $0xa0] sm:$0xff]   ;;  %v2524_v62 = vld [vmem:[#allocation3 + $0x98] sm:$0xff]   ;;  %v2527_v17 = vld [vmem:[#allocation3 + $0x10] sm:$0xff]   ;;  %v2230_v43 = vpack.c.bf16 %v3018_v11, %v3026_v14  ;;  %v2233_v11 = vpack.c.bf16 %v3014_v63, %v3022_v12  ;;  %p2627_p5 = pnand %p2626_p4, %p2620_p1 }
 0x418   :  { %2288 = vmatpush3.bf16.msra.mxu0 %v2512_v52  ;;  %2261 = vmatprep.subr.bf16.mxu1 %v2513_v25  ;;  %v2528_v19 = vld [vmem:[#allocation3 + $0x90] sm:$0xff]   ;;  %v2529_v29 = vld [vmem:[#allocation3 + $0x48] sm:$0xff]   ;;  %v2533_v41 = vld [vmem:[#allocation3 + $0x40] sm:$0xff]  }
 0x419   :  { %2289 = vmatprep.subr.bf16.mxu0 %v2514_v45  ;;  %v2530_v35 = vld [vmem:[#allocation3 + $0xc8] sm:$0xff]   ;;  %v2534_v1 = vld [vmem:[#allocation3 + $0xc0] sm:$0xff]   ;;  %v2537_v42 = vld [vmem:[#allocation3 + $0x178] sm:$0xff]  }
 0x41a   :  { %v2531_v37 = vld [vmem:[#allocation3 + $0x8] sm:$0xff]   ;;  %v2535_v46 = vld [vmem:[#allocation3] sm:$0xff]   ;;  %v2538_v8 = vld [vmem:[#allocation3 + $0x138] sm:$0xff]  }
 0x41b   :  { %2262 = vmatpush3.bf16.msra.mxu1 %v2515_v38  ;;  %v2532_v21 = vld [vmem:[#allocation3 + $0x88] sm:$0xff]   ;;  %v2536_v27 = vld [vmem:[#allocation3 + $0x80] sm:$0xff]   ;;  %v2539_v52 = vld [vmem:[#allocation3 + $0x170] sm:$0xff]  }
 0x41c   :  { %2290 = vmatpush3.bf16.msra.mxu0 %v2516_v47  ;;  %2263 = vmatprep.subr.bf16.mxu1 %v2517_v49  ;;  %v2540_v25 = vld [vmem:[#allocation3 + $0x130] sm:$0xff]   ;;  %v2541_v54 = vld [vmem:[#allocation3 + $0x168] sm:$0xff]   ;;  %v2543_v14 = vld [vmem:[#allocation3 + $0x160] sm:$0xff]  }
 0x41d   :  { %2291 = vmatprep.subr.bf16.mxu0 %v2518_v57  ;;  %v2542_v59 = vld [vmem:[#allocation3 + $0x128] sm:$0xff]   ;;  %v2544_v53 = vld [vmem:[#allocation3 + $0x120] sm:$0xff]   ;;  %v2545_v23 = vld [vmem:[#allocation3 + $0x158] sm:$0xff]  }
 0x41e   :  { %v2546_v18 = vld [vmem:[#allocation3 + $0x118] sm:$0xff]   ;;  %v2547_v63 = vld [vmem:[#allocation3 + $0x150] sm:$0xff]   ;;  %v2549_v12 = vld [vmem:[#allocation3 + $0x148] sm:$0xff]  }
 0x41f   :  { %2264 = vmatpush3.bf16.msra.mxu1 %v2519_v58  ;;  %v2548_v30 = vld [vmem:[#allocation3 + $0x110] sm:$0xff]   ;;  %v2550_v36 = vld [vmem:[#allocation3 + $0x108] sm:$0xff]   ;;  %v2551_v44 = vld [vmem:[#allocation3 + $0x140] sm:$0xff]  }
 0x420   :  { %2292 = vmatpush3.bf16.msra.mxu0 %v2520_v61  ;;  %2265 = vmatprep.subr.bf16.mxu1 %v2521_v51  ;;  %v2552_v28 = vld [vmem:[#allocation3 + $0x100] sm:$0xff]  }
 0x421   :  { %2293 = vmatprep.subr.bf16.mxu0 %v2522_v34 }
 0x423   :  { %2266 = vmatpush3.bf16.msra.mxu1 %v2523_v39 }
 0x424   :  { %2294 = vmatpush3.bf16.msra.mxu0 %v2524_v62  ;;  %2267 = vmatprep.subr.bf16.mxu1 %v2525_v15 }
 0x425   :  { %2295 = vmatprep.subr.bf16.mxu0 %v2526_v16 }
 0x427   :  { %2268 = vmatpush3.bf16.msra.mxu1 %v2527_v17 }
 0x428   :  { %2296 = vmatpush3.bf16.msra.mxu0 %v2528_v19  ;;  %2269 = vmatprep.subr.bf16.mxu1 %v2529_v29 }
 0x429   :  { %2297 = vmatprep.subr.bf16.mxu0 %v2530_v35 }
 0x42b   :  { %2270 = vmatpush3.bf16.msra.mxu1 %v2531_v37 }
 0x42c   :  { %2298 = vmatpush3.bf16.msra.mxu0 %v2532_v21  ;;  %2271 = vmatprep.subr.bf16.mxu1 %v2533_v41 }
 0x42d   :  { %2299 = vmatprep.subr.bf16.mxu0 %v2534_v1 }
 0x42f   :  { %2272 = vmatpush3.bf16.msra.mxu1 %v2535_v46 }
 0x430   :  { %2300 = vmatpush3.bf16.msra.mxu0 %v2536_v27  ;;  %2313 = vmatprep.subr.bf16.mxu1 %v2537_v42 }
 0x432   :  { %2228 = vmatmul.mubr.msk.bf16.vlgmr.msra.gmra.mxu1 %vm2876_vm15, %v2227_v24 }
 0x433   :  { %1783 = vmatmul.mubr.bf16.vlgmr.msra.gmra.mxu0 %v1303_v33  ;;  %2314 = vmatpush3.bf16.msra.mxu1 %v2538_v8  ;;  %v2242_v33 = vpack.c.bf16 %v3071_v56, %v3055_v55 }
 0x434   :  { %2315 = vmatprep.subr.bf16.mxu1 %v2539_v52  ;;  %2231 = vmatprep.mubr.msk.bf16.mxu1 %vm2901_vm6, %v2230_v43 }
 0x435   :  { %1790 = vmatprep.mubr.bf16.mxu0 %v1310_v40 }
 0x437   :  { %2316 = vmatpush3.bf16.msra.mxu1 %v2540_v25 }
 0x438   :  { %2317 = vmatprep.subr.bf16.mxu1 %v2541_v54 }
 0x43a   :  { %2234 = vmatmul.mubr.msk.bf16.gmra.mxu1 %vm2901_vm6, %v2233_v11 }
 0x43b   :  { %2318 = vmatpush3.bf16.msra.mxu1 %v2542_v59  ;;  %1791 = vmatmul.mubr.bf16.gmra.mxu0 %v1309_v31 }
 0x43c   :  { %2319 = vmatprep.subr.bf16.mxu1 %v2543_v14  ;;  %2237 = vmatprep.mubr.msk.bf16.mxu1 %vm2885_vm0, %v2236_v26 }
 0x43d   :  { %1916 = vmatprep.mubr.f32.mxu0 %v2650_v13 }
 0x43f   :  { %2320 = vmatpush3.bf16.msra.mxu1 %v2544_v53 }
 0x440   :  { %2321 = vmatprep.subr.bf16.mxu1 %v2545_v23 }
 0x443   :  { %2322 = vmatpush3.bf16.msra.mxu1 %v2546_v18 }
 0x444   :  { %2323 = vmatprep.subr.bf16.mxu1 %v2547_v63 }
 0x447   :  { %2324 = vmatpush3.bf16.msra.mxu1 %v2548_v30 }
 0x448   :  { %2325 = vmatprep.subr.bf16.mxu1 %v2549_v12 }
 0x44b   :  { %2326 = vmatpush3.bf16.msra.mxu1 %v2550_v36 }
 0x44c   :  { %2327 = vmatprep.subr.bf16.mxu1 %v2551_v44 }
 0x44f   :  { %2328 = vmatpush3.bf16.msra.mxu1 %v2552_v28 }
 0x452   :  { %2240 = vmatmul.mubr.msk.bf16.vlgmr.msra.gmra.mxu1 %vm2885_vm0, %v2239_v20 }
 0x453   :  { %2243 = vmatprep.mubr.msk.bf16.mxu1 %vm2910_vm2, %v2242_v33 }
 0x45a   :  { %2246 = vmatmul.mubr.msk.bf16.gmra.mxu1 %vm2910_vm2, %v2245_v0 }
 0x4f2   :  { %v2273_v31 = vpop.f32.mrf.mxu1 }
 0x4f3   :  { %v2301_v7 = vpop.f32.mrf.mxu0 }
 0x4f4   :  { %v2274_v40 = vpop.f32.mrf.mxu1 }
 0x4f5   :  { %v2302_v38 = vpop.f32.mrf.mxu0  ;;  %v2275_v1 = vadd.f32 %v2274_v40, %v2273_v31 }
 0x4f6   :  { %v2276_v45 = vpop.f32.mrf.mxu1  ;;  %v2303_v46 = vadd.f32 %v2302_v38, %v2301_v7 }
 0x4f7   :  { %v2304_v55 = vpop.f32.mrf.mxu0 }
 0x4f8   :  { %v2277_v9 = vpop.f32.mrf.mxu1  ;;  %v1785_v59 = vadd.f32 %v2303_v46, %v2275_v1 }
 0x4f9   :  { %v2305_v60 = vpop.f32.mrf.mxu0  ;;  %v2278_v37 = vadd.f32 %v2277_v9, %v2276_v45 }
 0x4fa   :  { %v2279_v47 = vpop.f32.mrf.mxu1  ;;  %v2306_v21 = vadd.f32 %v2305_v60, %v2304_v55 }
 0x4fb   :  { %v2307_v57 = vpop.f32.mrf.mxu0 }
 0x4fc   :  { %v2280_v56 = vpop.f32.mrf.mxu1  ;;  %v1788_v52 = vadd.f32 %v2306_v21, %v2278_v37 }
 0x4fd   :  { %v2308_v61 = vpop.f32.mrf.mxu0  ;;  %v2281_v16 = vadd.f32 %v2280_v56, %v2279_v47 }
 0x4fe   :  { %v2282_v49 = vpop.f32.mrf.mxu1  ;;  %v2309_v17 = vadd.f32 %v2308_v61, %v2307_v57 }
 0x4ff   :  { %v2310_v50 = vpop.f32.mrf.mxu0 }
 0x500   :  { %v2283_v58 = vpop.f32.mrf.mxu1  ;;  %v1793_v24 = vadd.f32 %v2309_v17, %v2281_v16 }
 0x501   :  { %v2311_v39 = vpop.f32.mrf.mxu0  ;;  %v2284_v19 = vadd.f32 %v2283_v58, %v2282_v49 }
 0x502   :  { %v2312_v29 = vadd.f32 %v2311_v39, %v2310_v50 }
 0x504   :  { %v1796_v42 = vadd.f32 %v2312_v29, %v2284_v19 }
 0x512   :  { %v2329_v51 = vpop.f32.mrf.mxu1 }
 0x514   :  { %v2330_v34 = vpop.f32.mrf.mxu1 }
 0x515   :  { %v2331_v25 = vadd.f32 %v2330_v34, %v2329_v51 }
 0x516   :  { %v2332_v10 = vpop.f32.mrf.mxu1 }
 0x517   :  { %v1834_v53 = vadd.f32 %v2331_v25, %v1785_v59 }
 0x518   :  { %v2333_v32 = vpop.f32.mrf.mxu1 }
 0x519   :  { %v2334_v8 = vadd.f32 %v2333_v32, %v2332_v10  ;;  %v1848_v63 = vmul.f32 %v1834_v53, %v1834_v53 }
 0x51a   :  { %v2335_v62 = vpop.f32.mrf.mxu1 }
 0x51b   :  { %v1837_v14 = vadd.f32 %v2334_v8, %v1788_v52 }
 0x51c   :  { %v2336_v15 = vpop.f32.mrf.mxu1 }
 0x51d   :  { %v2337_v41 = vadd.f32 %v2336_v15, %v2335_v62  ;;  %v1849_v18 = vmul.f32 %v1837_v14, %v1837_v14 }
 0x51e   :  { %v2338_v35 = vpop.f32.mrf.mxu1 }
 0x51f   :  { %v1842_v54 = vadd.f32 %v2337_v41, %v1793_v24 }
 0x520   :  { %v2339_v27 = vpop.f32.mrf.mxu1 }
 0x521   :  { %v2340_v43 = vadd.f32 %v2339_v27, %v2338_v35  ;;  %v1850_v23 = vmul.f32 %v1842_v54, %v1842_v54 }
 0x523   :  { %v1845_v11 = vadd.f32 %v2340_v43, %v1796_v42 }
 0x525   :  { %v1851_v26 = vmul.f32 %v1845_v11, %v1845_v11 }
 0x527   :  { %1876 = vmatprep.subr.mxu0 %v1851_v26 }
 0x528   :  { %1877 = vmatpush1.msra.mxu0 %v1845_v11 }
 0x529   :  { %1878 = vmatprep.subr.mxu0 %v1850_v23 }
 0x52a   :  { %1879 = vmatpush1.msra.mxu0 %v1842_v54 }
 0x52b   :  { %1880 = vmatprep.subr.mxu0 %v1849_v18 }
 0x52c   :  { %1881 = vmatpush1.msra.mxu0 %v1837_v14 }
 0x52d   :  { %1882 = vmatprep.subr.mxu0 %v1848_v63 }
 0x52e   :  { %1883 = vmatpush1.msra.mxu0 %v1834_v53 }
 0x52f   :  { %2247 = vmatmul.mubr.msk.f32.vlgmr.msra.gmra.mxu0 %vm171_vm1, %v2651_v22  ;;  %2356 = vmatprep.subr.mxu0 %v2650_v13 }
 0x530   :  { %2364 = vmatprep.mubr.msk.f32.mxu0 %vm2657_vm8, %v2650_v13 }
 0x5ef   :  { %v1918_v30 = vpop.f32.mrf.mxu0 }
 0x5f0   :  { %v1923_v12 = vmul.f32 0.03125, %v1918_v30 }
 0x5f1   :  { %v1920_v36 = vpop.f32.mrf.mxu0 }
 0x5f2   :  { %v1925_v44 = vmul.f32 %v1923_v12, %v1923_v12  ;;  %v1924_v28 = vmul.f32 0.03125, %v1920_v36 }
 0x5f4   :  { %v1926_v20 = vsub.f32 %v1924_v28, %v1925_v44 }
 0x5f6   :  { %v1927_v33 = vadd.f32 1e-05, %v1926_v20 }
 0x5f8   :  { %2553 = vrsqrt.f32 %v1927_v33 }
 0x605   :  { %v2554_v0 = vpop.eup %2553 }
 0x606   :  { %v1929_v31 = vmul.f32 %v2554_v0, %v2691_v2 }
 0x608   :  { %v1930_v40 = vmul.f32 %v1929_v31, %v1923_v12  ;;  %v1935_v45 = vrot.slane %v1929_v31, %v2785_v48 }
 0x60a   :  { %v1931_v22 = vsub.f32 %v2693_v3, %v1930_v40  ;;  %v1939_v9 = vmul.f32 %v1935_v45, %v1845_v11  ;;  %v1938_v38 = vmul.f32 %v1935_v45, %v1842_v54  ;;  %v1937_v56 = vmul.f32 %v1935_v45, %v1837_v14 }
 0x60b   :  { %v1936_v57 = vmul.f32 %v1935_v45, %v1834_v53 }
 0x60c   :  { %v1943_v7 = vrot.slane %v1931_v22, %v2785_v48 }
 0x60e   :  { %v1947_v47 = vadd.f32 %v1943_v7, %v1939_v9  ;;  %v1946_v55 = vadd.f32 %v1943_v7, %v1938_v38  ;;  %v1945_v49 = vadd.f32 %v1943_v7, %v1937_v56  ;;  %v1944_v61 = vadd.f32 %v1943_v7, %v1936_v57 }
 0x610   :  { %v1951_v60 = vmax.f32 %v1947_v47, 0.0  ;;  %v1950_v58 = vmax.f32 %v1946_v55, 0.0  ;;  %v1949_v2 = vmax.f32 %v1945_v49, 0.0  ;;  %v1948_v3 = vmax.f32 %v1944_v61, 0.0 }
 0x612   :  { %2357 = vmatpush3.msra.mxu0 %v1951_v60 }
 0x613   :  { %2358 = vmatprep.subr.mxu0 %v2650_v13 }
 0x614   :  { %2359 = vmatpush3.msra.mxu0 %v1950_v58 }
 0x615   :  { %2360 = vmatprep.subr.mxu0 %v2650_v13 }
 0x616   :  { %2361 = vmatpush3.msra.mxu0 %v1949_v2 }
 0x617   :  { %2362 = vmatprep.subr.mxu0 %v2650_v13 }
 0x618   :  { %2363 = vmatpush3.msra.mxu0 %v1948_v3 }
 0x619   :  { %2365 = vmatmul.mubr.msk.f32.vlgmr.msra.gmra.mxu0 %vm171_vm1, %v2699_v6 }
 0x6d9   :  { %v2021_v48 = vpop.f32.mrf.mxu0 }
 0x6da   :  { %v2025_v51 = vmul.f32 %v2021_v48, %v2695_v4 }
 0x6db   :  { %v2366_v34 = vpop.f32.mrf.mxu0 }
 0x6dc   :  { %2026 = vadd.xlane.f32.xlu0 %v2025_v51 }
 0x765   :  { %v2027_v50 = vpop.xlane.xlu0 %2026 }
 0x766   :  { %v2028_v10 = vadd.f32 %v2027_v50, %v2697_v5 }
 0x768   :  { %v2029_v32 = vsub.f32 0.0, %v2028_v10 }
 0x76a   :  { %v2030_v39 = vmul.f32 1.442695, %v2029_v32 }
 0x76c   :  { %2555 = vpow2.f32 %v2030_v39 }
 0x779   :  { %v2556_v62 = vpop.eup %2555 }
 0x77a   :  { %v2032_v15 = vadd.f32 1.0, %v2556_v62 }
 0x77c   :  { %2557 = vrcp.f32 %v2032_v15 }
 0x789   :  { %v2558_v13 = vpop.eup %2557 }
 0x78a   :  { %2035 = vst [vmem:[#allocation8] sm:$0xff] %v2558_v13 }
 0x78b   :  { %2630 = shalt.err (!%p2627_p5)
}
 0x78c   :  { %2045 = dma.vmem_to_hbm [thread:$0]  %s2043_s3, 128, %s3139_s4, [#allocation7]  }
 0x78d   :  { %2645 = dma.done.wait [#allocation7], 128  }
 0x78e   :  { %2646 = vsyncadd [#allocation7], 4294967168 }
 0x78f   :  { %2049 = vsyncpa [#allocation6], 1 }
 0x790   :  { %2050 = vsyncpa [#allocation7], 1 }
 0x791   :  { %2051 = vsyncmov [#allocation4] }
 0x794   :  { %s2052_s15 = vpop.sfrf %2051 }
 0x795   :  { %p2249_p6 = scmp.ne.s32.totalorder %s2052_s15, 0 }
 0x797   :  { %2056 = shalt.err (%p2249_p6)  }
 0x798   :  { %2058 = vsyncmov [#allocation4 + $0x1] }
 0x79b   :  { %s2059_s16 = vpop.sfrf %2058 }
 0x79c   :  { %p2250_p7 = scmp.ne.s32.totalorder %s2059_s16, 0 }
 0x79e   :  { %2063 = shalt.err (%p2250_p7)  }

</bundles_post_ra>
